<compile_context>
chip_gen: v7x
topology: tpu7x:2x2x1
jax: 0.10.0
libtpu: 0.0.40
codegen_flags: <defaults>
</compile_context>

<pallas_src>
import functools

import jax
import jax.numpy as jnp
from jax.experimental import pallas as pl
from jax.experimental.pallas import tpu as pltpu

NUM_LAYERS = 2


# ----------------------------------------------------------------------------
# Single fused kernel: one-hot embedding/input-projection matmul + 2-layer
# LSTM recurrence + LeakyReLU + last-batch select + fc + softmax.
# ----------------------------------------------------------------------------
def _fused_kernel(ids_ref,                 # (S*B, 1) int32 token ids
                  ew_ref,                  # (V, 4H)  emb @ W_ih0^T (g cols *2)
                  whh0_ref,                # (H, 4H)  W_hh^T layer 0 (g cols *2)
                  b0_ref,                  # (1, 4H)  b_ih + b_hh layer 0
                  wih1_ref,                # (H, 4H)  W_ih^T layer 1 (g cols *2)
                  whh1_ref,                # (H, 4H)  W_hh^T layer 1 (g cols *2)
                  b1_ref,                  # (1, 4H)  b_ih + b_hh layer 1
                  fcw_ref,                 # (H, V)   fc weight^T
                  fcb_ref,                 # (1, V)   fc bias
                  h0_ref, c0_ref,          # (2, B, H) initial states
                  logits_ref,              # (S, V)   output probabilities
                  hf_ref, cf_ref,          # (2, B, H) final states
                  last_sc,                 # VMEM (S, H) last-batch hidden rows
                  *, seq_len, batch, hidden_dim, vocab_size):
    S, B, H, V = seq_len, batch, hidden_dim, vocab_size

    # ---- Embedding gather folded into layer-0 input projection -------------
    # onehot @ EW  ==  emb[ids] @ W_ih0^T : one VPU compare + one MXU push.
    ids = ids_ref[...]                                           # (S*B, 1)
    iota = jax.lax.broadcasted_iota(jnp.int32, (S * B, V), 1)    # lane iota
    onehot = (iota == ids).astype(jnp.float32)                   # (S*B, V)
    gates_ih0 = (jnp.dot(onehot, ew_ref[...],
                         preferred_element_type=jnp.float32) + b0_ref[...])

    whh0 = whh0_ref[...]
    wih1 = wih1_ref[...]
    whh1 = whh1_ref[...]
    b1 = b1_ref[...]

    # Carried states (PyTorch gate order i, f, g, o).
    h0p = h0_ref[0]
    c0p = c0_ref[0]
    h1p = h0_ref[1]
    c1p = c0_ref[1]

    def lstm_activations(gates, c_prev):
        # g-gate columns were pre-scaled by 2, so a single full-vreg sigmoid
        # covers all four gates: tanh(x) = 2*sigmoid(2x) - 1.
        sg = jax.nn.sigmoid(gates)                      # (B, 4H)
        i = sg[:, 0 * H:1 * H]
        f = sg[:, 1 * H:2 * H]
        g = 2.0 * sg[:, 2 * H:3 * H] - 1.0              # = tanh(g_raw)
        o = sg[:, 3 * H:4 * H]
        c_new = f * c_prev + i * g
        h_new = o * jnp.tanh(c_new)
        return h_new, c_new

    for t in range(S):                      # static unrolled time loop (S small)
        # Layer 0: only the recurrent matmul remains on the serial path.
        g0 = gates_ih0[t * B:(t + 1) * B, :] + jnp.dot(
            h0p, whh0, preferred_element_type=jnp.float32)
        h0p, c0p = lstm_activations(g0, c0p)

        # Layer 1: two K=32 dots instead of a lane-concat + one K=64 dot.
        g1 = (jnp.dot(h0p, wih1, preferred_element_type=jnp.float32)
              + jnp.dot(h1p, whh1, preferred_element_type=jnp.float32) + b1)
        h1p, c1p = lstm_activations(g1, c1p)

        # Only output[t, B-1, :] is consumed downstream; write it out now so
        # the row doesn't stay live across the rest of the unrolled loop.
        last_sc[t:t + 1, :] = h1p[B - 1:B, :]

    # Final LSTM state (raw, no LeakyReLU — matches PyTorch semantics).
    hf_ref[0] = h0p
    hf_ref[1] = h1p
    cf_ref[0] = c0p
    cf_ref[1] = c1p

    # ---- Epilogue: LeakyReLU -> (Dropout eval = identity) -> fc -> softmax --
    last = last_sc[...]                                       # (S, H)
    last = jnp.where(last > 0, last, 0.1 * last)              # LeakyReLU(0.1)
    # TODO(synk): Dropout(p=0.2) reproduced in inference mode (identity).
    logits = (jnp.dot(last, fcw_ref[...], preferred_element_type=jnp.float32)
              + fcb_ref[...])                                 # (S, V)
    m = jnp.max(logits, axis=-1, keepdims=True)
    e = jnp.exp(logits - m)
    denom = jnp.sum(e, axis=-1, keepdims=True)
    # Exact reciprocal keeps row sums within 1e-4 of 1.0.
    logits_ref[...] = e * pl.reciprocal(denom)


def fused_forward(x_ids, ew, whh0_t, b0, wih1_t, whh1_t, b1, fcw_t, fcb, h0, c0):
    S, B = x_ids.shape
    V = ew.shape[0]
    H = h0.shape[-1]

    ids_col = x_ids.reshape(S * B, 1).astype(jnp.int32)

    kernel = functools.partial(_fused_kernel, seq_len=S, batch=B,
                               hidden_dim=H, vocab_size=V)

    grid_spec = pltpu.PrefetchScalarGridSpec(
        num_scalar_prefetch=0,
        grid=(1,),
        in_specs=[
            pl.BlockSpec((S * B, 1), lambda i: (0, 0)),               # token ids
            pl.BlockSpec((V, 4 * H), lambda i: (0, 0)),               # EW
            pl.BlockSpec((H, 4 * H), lambda i: (0, 0)),               # W_hh^T l0
            pl.BlockSpec((1, 4 * H), lambda i: (0, 0)),               # bias   l0
            pl.BlockSpec((H, 4 * H), lambda i: (0, 0)),               # W_ih^T l1
            pl.BlockSpec((H, 4 * H), lambda i: (0, 0)),               # W_hh^T l1
            pl.BlockSpec((1, 4 * H), lambda i: (0, 0)),               # bias   l1
            pl.BlockSpec((H, V), lambda i: (0, 0)),                   # fc W^T
            pl.BlockSpec((1, V), lambda i: (0, 0)),                   # fc bias
            pl.BlockSpec((NUM_LAYERS, B, H), lambda i: (0, 0, 0)),    # h0
            pl.BlockSpec((NUM_LAYERS, B, H), lambda i: (0, 0, 0)),    # c0
        ],
        out_specs=(
            pl.BlockSpec((S, V), lambda i: (0, 0)),
            pl.BlockSpec((NUM_LAYERS, B, H), lambda i: (0, 0, 0)),
            pl.BlockSpec((NUM_LAYERS, B, H), lambda i: (0, 0, 0)),
        ),
        scratch_shapes=[pltpu.VMEM((S, H), jnp.float32)],
    )

    return pl.pallas_call(
        kernel,
        out_shape=(jax.ShapeDtypeStruct((S, V), jnp.float32),
                   jax.ShapeDtypeStruct((NUM_LAYERS, B, H), jnp.float32),
                   jax.ShapeDtypeStruct((NUM_LAYERS, B, H), jnp.float32)),
        grid_spec=grid_spec,
        compiler_params=pltpu.CompilerParams(
            dimension_semantics=("arbitrary",),
            vmem_limit_bytes=8 * 1024 * 1024),
        cost_estimate=pl.CostEstimate(flops=6_000_000,
                                      transcendentals=23_000,
                                      bytes_accessed=240_000),
    )(ids_col, ew, whh0_t, b0, wih1_t, whh1_t, b1, fcw_t, fcb, h0, c0)


# ----------------------------------------------------------------------------
# Model wrapper (parameter setup in plain JAX; forward = one pallas_call).
# ----------------------------------------------------------------------------
class PallasModel:
    def __init__(self, embedding_dim, hidden_dim, vocab_size=5000,
                 num_layers=2, key=jax.random.PRNGKey(42)):
        assert num_layers == NUM_LAYERS, "kernel is specialized to 2 layers"
        self.embedding_dim = embedding_dim
        self.hidden_dim = hidden_dim
        self.vocab_size = vocab_size
        self.num_layers = num_layers

        keys = jax.random.split(key, 12)
        H, E, V = hidden_dim, embedding_dim, vocab_size
        k = 1.0 / jnp.sqrt(jnp.float32(H))

        # Embedding ~ N(0, 1)  (torch.nn.Embedding default)
        emb_table = jax.random.normal(keys[0], (V, E), jnp.float32)

        def u(kk, shape):
            return jax.random.uniform(kk, shape, jnp.float32, -k, k)

        # Pre-scale the g-gate (cell-candidate) columns by 2 so the kernel can
        # compute tanh(g) as 2*sigmoid(2g)-1 with a single sigmoid pass.
        g_scale = jnp.concatenate(
            [jnp.ones((1, 2 * H)), 2.0 * jnp.ones((1, H)), jnp.ones((1, H))],
            axis=1)                                              # (1, 4H)

        # LSTM layer 0 (input E) and layer 1 (input H); weights pre-transposed,
        # biases fused, embedding folded into the layer-0 input projection.
        wih0 = u(keys[1], (4 * H, E)); whh0 = u(keys[2], (4 * H, H))
        b0 = (u(keys[3], (4 * H,)) + u(keys[4], (4 * H,))).reshape(1, 4 * H)
        wih1 = u(keys[5], (4 * H, H)); whh1 = u(keys[6], (4 * H, H))
        b1 = (u(keys[7], (4 * H,)) + u(keys[8], (4 * H,))).reshape(1, 4 * H)

        wih0_t = wih0.T * g_scale                                # (E, 4H)
        self.ew = emb_table @ wih0_t                             # (V, 4H)
        self.whh0_t = whh0.T * g_scale                           # (H, 4H)
        self.b0 = b0 * g_scale
        self.wih1_t = wih1.T * g_scale                           # (H, 4H)
        self.whh1_t = whh1.T * g_scale                           # (H, 4H)
        self.b1 = b1 * g_scale

        # fc: Linear(H, V)
        self.fc_w_t = u(keys[9], (V, H)).T              # (H, V)
        self.fc_b = u(keys[10], (V,)).reshape(1, V)     # (1, V)

    def init_state(self, n):
        return (jnp.zeros((self.num_layers, n, self.hidden_dim), jnp.float32),
                jnp.zeros((self.num_layers, n, self.hidden_dim), jnp.float32))

    def forward(self, x, prev_state):
        h0, c0 = prev_state
        logits, hf, cf = fused_forward(
            x.astype(jnp.int32), self.ew,
            self.whh0_t, self.b0,
            self.wih1_t, self.whh1_t, self.b1,
            self.fc_w_t, self.fc_b, h0, c0)
        return logits, (hf, cf)


if __name__ == "__main__":
    S, B = 8, 8                      # seq_len, batch
    E, H, V = 32, 32, 256            # embedding_dim, hidden_dim, vocab_size

    model = PallasModel(embedding_dim=E, hidden_dim=H, vocab_size=V,
                        num_layers=2, key=jax.random.PRNGKey(42))

    key = jax.random.PRNGKey(0)
    x = jax.random.randint(key, (S, B), 0, V, dtype=jnp.int32)
    prev_state = model.init_state(B)

    logits, (h_n, c_n) = model.forward(x, prev_state)
    jax.block_until_ready((logits, h_n, c_n))

    assert logits.shape == (S, V)
    assert h_n.shape == (NUM_LAYERS, B, H) and c_n.shape == (NUM_LAYERS, B, H)
    assert bool(jnp.all(jnp.isfinite(logits)))
    # softmax rows sum to 1
    assert bool(jnp.allclose(jnp.sum(logits, axis=-1), 1.0, atol=1e-4))
    print("KERNEL_OK")
</pallas_src>

<mosaic_0001>
module attributes {stable_mosaic.version = 11 : i64} {
  func.func @_fused_kernel(%arg0: i32, %arg1: memref<64x1xi32, #tpu.memory_space<vmem>>, %arg2: memref<256x128xf32, #tpu.memory_space<vmem>>, %arg3: memref<32x128xf32, #tpu.memory_space<vmem>>, %arg4: memref<1x128xf32, #tpu.memory_space<vmem>>, %arg5: memref<32x128xf32, #tpu.memory_space<vmem>>, %arg6: memref<32x128xf32, #tpu.memory_space<vmem>>, %arg7: memref<1x128xf32, #tpu.memory_space<vmem>>, %arg8: memref<32x256xf32, #tpu.memory_space<vmem>>, %arg9: memref<1x256xf32, #tpu.memory_space<vmem>>, %arg10: memref<2x8x32xf32, #tpu.memory_space<vmem>>, %arg11: memref<2x8x32xf32, #tpu.memory_space<vmem>>, %arg12: memref<8x256xf32, #tpu.memory_space<vmem>>, %arg13: memref<2x8x32xf32, #tpu.memory_space<vmem>>, %arg14: memref<2x8x32xf32, #tpu.memory_space<vmem>>, %arg15: memref<8x32xf32, #tpu.memory_space<vmem>>) attributes {dimension_semantics = [#tpu.dimension_semantics<arbitrary>], iteration_bounds = array<i64: 1>, scalar_prefetch = 0 : i64, scratch_operands = 1 : i64, tpu.core_type = #tpu.core_type<tc>, window_params = [{pipeline_mode = #tpu.pipeline_mode<synchronous>, transform_indices = @transform_0, window_bounds = array<i64: 64, 1>}, {pipeline_mode = #tpu.pipeline_mode<synchronous>, transform_indices = @transform_1, window_bounds = array<i64: 256, 128>}, {pipeline_mode = #tpu.pipeline_mode<synchronous>, transform_indices = @transform_2, window_bounds = array<i64: 32, 128>}, {pipeline_mode = #tpu.pipeline_mode<synchronous>, transform_indices = @transform_3, window_bounds = array<i64: 1, 128>}, {pipeline_mode = #tpu.pipeline_mode<synchronous>, transform_indices = @transform_4, window_bounds = array<i64: 32, 128>}, {pipeline_mode = #tpu.pipeline_mode<synchronous>, transform_indices = @transform_5, window_bounds = array<i64: 32, 128>}, {pipeline_mode = #tpu.pipeline_mode<synchronous>, transform_indices = @transform_6, window_bounds = array<i64: 1, 128>}, {pipeline_mode = #tpu.pipeline_mode<synchronous>, transform_indices = @transform_7, window_bounds = array<i64: 32, 256>}, {pipeline_mode = #tpu.pipeline_mode<synchronous>, transform_indices = @transform_8, window_bounds = array<i64: 1, 256>}, {pipeline_mode = #tpu.pipeline_mode<synchronous>, transform_indices = @transform_9, window_bounds = array<i64: 2, 8, 32>}, {pipeline_mode = #tpu.pipeline_mode<synchronous>, transform_indices = @transform_10, window_bounds = array<i64: 2, 8, 32>}, {pipeline_mode = #tpu.pipeline_mode<synchronous>, transform_indices = @transform_11, window_bounds = array<i64: 8, 256>}, {pipeline_mode = #tpu.pipeline_mode<synchronous>, transform_indices = @transform_12, window_bounds = array<i64: 2, 8, 32>}, {pipeline_mode = #tpu.pipeline_mode<synchronous>, transform_indices = @transform_13, window_bounds = array<i64: 2, 8, 32>}]} {
    %c0 = arith.constant 0 : index
    %c0_0 = arith.constant 0 : index
    %0 = vector.load %arg1[%c0, %c0_0] : memref<64x1xi32, #tpu.memory_space<vmem>>, vector<64x1xi32>
    %1 = tpu.iota {dimensions = array<i32: 1>} : vector<64x256xi32>
    %2 = vector.broadcast %0 : vector<64x1xi32> to vector<64x256xi32>
    %3 = arith.cmpi eq, %1, %2 : vector<64x256xi32>
    %4 = arith.extui %3 : vector<64x256xi1> to vector<64x256xi32>
    %5 = arith.sitofp %4 : vector<64x256xi32> to vector<64x256xf32>
    %c0_1 = arith.constant 0 : index
    %c0_2 = arith.constant 0 : index
    %6 = vector.load %arg2[%c0_1, %c0_2] : memref<256x128xf32, #tpu.memory_space<vmem>>, vector<256x128xf32>
    %cst = arith.constant dense<0.000000e+00> : vector<64x128xf32>
    %7 = tpu.matmul %5, %6, %cst {dimension_numbers = #tpu.dot_dimension_numbers<[1], [0], [0], [1], [0, 0, 1, 1], [], []>} : vector<64x256xf32>, vector<256x128xf32>, vector<64x128xf32> -> vector<64x128xf32>
    %c0_3 = arith.constant 0 : index
    %c0_4 = arith.constant 0 : index
    %8 = vector.load %arg4[%c0_3, %c0_4] : memref<1x128xf32, #tpu.memory_space<vmem>>, vector<1x128xf32>
    %9 = vector.broadcast %8 : vector<1x128xf32> to vector<64x128xf32>
    %10 = arith.addf %7, %9 : vector<64x128xf32>
    %c0_5 = arith.constant 0 : index
    %c0_6 = arith.constant 0 : index
    %11 = vector.load %arg3[%c0_5, %c0_6] : memref<32x128xf32, #tpu.memory_space<vmem>>, vector<32x128xf32>
    %c0_7 = arith.constant 0 : index
    %c0_8 = arith.constant 0 : index
    %12 = vector.load %arg5[%c0_7, %c0_8] : memref<32x128xf32, #tpu.memory_space<vmem>>, vector<32x128xf32>
    %c0_9 = arith.constant 0 : index
    %c0_10 = arith.constant 0 : index
    %13 = vector.load %arg6[%c0_9, %c0_10] : memref<32x128xf32, #tpu.memory_space<vmem>>, vector<32x128xf32>
    %c0_11 = arith.constant 0 : index
    %c0_12 = arith.constant 0 : index
    %14 = vector.load %arg7[%c0_11, %c0_12] : memref<1x128xf32, #tpu.memory_space<vmem>>, vector<1x128xf32>
    %c0_13 = arith.constant 0 : index
    %c0_14 = arith.constant 0 : index
    %c0_15 = arith.constant 0 : index
    %15 = vector.load %arg10[%c0_13, %c0_14, %c0_15] : memref<2x8x32xf32, #tpu.memory_space<vmem>>, vector<1x8x32xf32>
    %16 = vector.shape_cast %15 : vector<1x8x32xf32> to vector<8x32xf32>
    %c0_16 = arith.constant 0 : index
    %c0_17 = arith.constant 0 : index
    %c0_18 = arith.constant 0 : index
    %17 = vector.load %arg11[%c0_16, %c0_17, %c0_18] : memref<2x8x32xf32, #tpu.memory_space<vmem>>, vector<1x8x32xf32>
    %18 = vector.shape_cast %17 : vector<1x8x32xf32> to vector<8x32xf32>
    %c1 = arith.constant 1 : index
    %c0_19 = arith.constant 0 : index
    %c0_20 = arith.constant 0 : index
    %19 = vector.load %arg10[%c1, %c0_19, %c0_20] : memref<2x8x32xf32, #tpu.memory_space<vmem>>, vector<1x8x32xf32>
    %20 = vector.shape_cast %19 : vector<1x8x32xf32> to vector<8x32xf32>
    %c1_21 = arith.constant 1 : index
    %c0_22 = arith.constant 0 : index
    %c0_23 = arith.constant 0 : index
    %21 = vector.load %arg11[%c1_21, %c0_22, %c0_23] : memref<2x8x32xf32, #tpu.memory_space<vmem>>, vector<1x8x32xf32>
    %22 = vector.shape_cast %21 : vector<1x8x32xf32> to vector<8x32xf32>
    %23 = vector.extract_strided_slice %10 {offsets = [0, 0], sizes = [8, 128], strides = [1, 1]} : vector<64x128xf32> to vector<8x128xf32>
    %cst_24 = arith.constant dense<0.000000e+00> : vector<8x128xf32>
    %24 = tpu.matmul %16, %11, %cst_24 {dimension_numbers = #tpu.dot_dimension_numbers<[1], [0], [0], [1], [0, 0, 1, 1], [], []>} : vector<8x32xf32>, vector<32x128xf32>, vector<8x128xf32> -> vector<8x128xf32>
    %25 = arith.addf %23, %24 : vector<8x128xf32>
    %26 = arith.negf %25 : vector<8x128xf32>
    %27 = math.exp %26 : vector<8x128xf32>
    %cst_25 = arith.constant 1.000000e+00 : f32
    %28 = vector.broadcast %cst_25 : f32 to vector<8x128xf32>
    %29 = arith.addf %28, %27 : vector<8x128xf32>
    %30 = arith.divf %28, %29 : vector<8x128xf32>
    %31 = vector.extract_strided_slice %30 {offsets = [0, 0], sizes = [8, 32], strides = [1, 1]} : vector<8x128xf32> to vector<8x32xf32>
    %32 = vector.extract_strided_slice %30 {offsets = [0, 32], sizes = [8, 32], strides = [1, 1]} : vector<8x128xf32> to vector<8x32xf32>
    %33 = vector.extract_strided_slice %30 {offsets = [0, 64], sizes = [8, 32], strides = [1, 1]} : vector<8x128xf32> to vector<8x32xf32>
    %cst_26 = arith.constant 2.000000e+00 : f32
    %34 = vector.broadcast %cst_26 : f32 to vector<8x32xf32>
    %35 = arith.mulf %34, %33 : vector<8x32xf32>
    %cst_27 = arith.constant 1.000000e+00 : f32
    %36 = vector.broadcast %cst_27 : f32 to vector<8x32xf32>
    %37 = arith.subf %35, %36 : vector<8x32xf32>
    %38 = vector.extract_strided_slice %30 {offsets = [0, 96], sizes = [8, 32], strides = [1, 1]} : vector<8x128xf32> to vector<8x32xf32>
    %39 = arith.mulf %32, %18 : vector<8x32xf32>
    %40 = arith.mulf %31, %37 : vector<8x32xf32>
    %41 = arith.addf %39, %40 : vector<8x32xf32>
    %42 = math.tanh %41 : vector<8x32xf32>
    %43 = arith.mulf %38, %42 : vector<8x32xf32>
    %cst_28 = arith.constant dense<0.000000e+00> : vector<8x128xf32>
    %44 = tpu.matmul %43, %12, %cst_28 {dimension_numbers = #tpu.dot_dimension_numbers<[1], [0], [0], [1], [0, 0, 1, 1], [], []>} : vector<8x32xf32>, vector<32x128xf32>, vector<8x128xf32> -> vector<8x128xf32>
    %cst_29 = arith.constant dense<0.000000e+00> : vector<8x128xf32>
    %45 = tpu.matmul %20, %13, %cst_29 {dimension_numbers = #tpu.dot_dimension_numbers<[1], [0], [0], [1], [0, 0, 1, 1], [], []>} : vector<8x32xf32>, vector<32x128xf32>, vector<8x128xf32> -> vector<8x128xf32>
    %46 = arith.addf %44, %45 : vector<8x128xf32>
    %47 = vector.broadcast %14 : vector<1x128xf32> to vector<8x128xf32>
    %48 = arith.addf %46, %47 : vector<8x128xf32>
    %49 = arith.negf %48 : vector<8x128xf32>
    %50 = math.exp %49 : vector<8x128xf32>
    %cst_30 = arith.constant 1.000000e+00 : f32
    %51 = vector.broadcast %cst_30 : f32 to vector<8x128xf32>
    %52 = arith.addf %51, %50 : vector<8x128xf32>
    %53 = arith.divf %51, %52 : vector<8x128xf32>
    %54 = vector.extract_strided_slice %53 {offsets = [0, 0], sizes = [8, 32], strides = [1, 1]} : vector<8x128xf32> to vector<8x32xf32>
    %55 = vector.extract_strided_slice %53 {offsets = [0, 32], sizes = [8, 32], strides = [1, 1]} : vector<8x128xf32> to vector<8x32xf32>
    %56 = vector.extract_strided_slice %53 {offsets = [0, 64], sizes = [8, 32], strides = [1, 1]} : vector<8x128xf32> to vector<8x32xf32>
    %cst_31 = arith.constant 2.000000e+00 : f32
    %57 = vector.broadcast %cst_31 : f32 to vector<8x32xf32>
    %58 = arith.mulf %57, %56 : vector<8x32xf32>
    %cst_32 = arith.constant 1.000000e+00 : f32
    %59 = vector.broadcast %cst_32 : f32 to vector<8x32xf32>
    %60 = arith.subf %58, %59 : vector<8x32xf32>
    %61 = vector.extract_strided_slice %53 {offsets = [0, 96], sizes = [8, 32], strides = [1, 1]} : vector<8x128xf32> to vector<8x32xf32>
    %62 = arith.mulf %55, %22 : vector<8x32xf32>
    %63 = arith.mulf %54, %60 : vector<8x32xf32>
    %64 = arith.addf %62, %63 : vector<8x32xf32>
    %65 = math.tanh %64 : vector<8x32xf32>
    %66 = arith.mulf %61, %65 : vector<8x32xf32>
    %67 = vector.extract_strided_slice %66 {offsets = [7, 0], sizes = [1, 32], strides = [1, 1]} : vector<8x32xf32> to vector<1x32xf32>
    %c0_33 = arith.constant 0 : index
    %c0_34 = arith.constant 0 : index
    %68 = vector.load %arg15[%c0_33, %c0_34] : memref<8x32xf32, #tpu.memory_space<vmem>>, vector<1x32xf32>
    tpu.vector_store %arg15[%c0_33, %c0_34], %67 {strides = array<i32>} : memref<8x32xf32, #tpu.memory_space<vmem>>, vector<1x32xf32>,
    %69 = vector.extract_strided_slice %10 {offsets = [8, 0], sizes = [8, 128], strides = [1, 1]} : vector<64x128xf32> to vector<8x128xf32>
    %cst_35 = arith.constant dense<0.000000e+00> : vector<8x128xf32>
    %70 = tpu.matmul %43, %11, %cst_35 {dimension_numbers = #tpu.dot_dimension_numbers<[1], [0], [0], [1], [0, 0, 1, 1], [], []>} : vector<8x32xf32>, vector<32x128xf32>, vector<8x128xf32> -> vector<8x128xf32>
    %71 = arith.addf %69, %70 : vector<8x128xf32>
    %72 = arith.negf %71 : vector<8x128xf32>
    %73 = math.exp %72 : vector<8x128xf32>
    %cst_36 = arith.constant 1.000000e+00 : f32
    %74 = vector.broadcast %cst_36 : f32 to vector<8x128xf32>
    %75 = arith.addf %74, %73 : vector<8x128xf32>
    %76 = arith.divf %74, %75 : vector<8x128xf32>
    %77 = vector.extract_strided_slice %76 {offsets = [0, 0], sizes = [8, 32], strides = [1, 1]} : vector<8x128xf32> to vector<8x32xf32>
    %78 = vector.extract_strided_slice %76 {offsets = [0, 32], sizes = [8, 32], strides = [1, 1]} : vector<8x128xf32> to vector<8x32xf32>
    %79 = vector.extract_strided_slice %76 {offsets = [0, 64], sizes = [8, 32], strides = [1, 1]} : vector<8x128xf32> to vector<8x32xf32>
    %cst_37 = arith.constant 2.000000e+00 : f32
    %80 = vector.broadcast %cst_37 : f32 to vector<8x32xf32>
    %81 = arith.mulf %80, %79 : vector<8x32xf32>
    %cst_38 = arith.constant 1.000000e+00 : f32
    %82 = vector.broadcast %cst_38 : f32 to vector<8x32xf32>
    %83 = arith.subf %81, %82 : vector<8x32xf32>
    %84 = vector.extract_strided_slice %76 {offsets = [0, 96], sizes = [8, 32], strides = [1, 1]} : vector<8x128xf32> to vector<8x32xf32>
    %85 = arith.mulf %78, %41 : vector<8x32xf32>
    %86 = arith.mulf %77, %83 : vector<8x32xf32>
    %87 = arith.addf %85, %86 : vector<8x32xf32>
    %88 = math.tanh %87 : vector<8x32xf32>
    %89 = arith.mulf %84, %88 : vector<8x32xf32>
    %cst_39 = arith.constant dense<0.000000e+00> : vector<8x128xf32>
    %90 = tpu.matmul %89, %12, %cst_39 {dimension_numbers = #tpu.dot_dimension_numbers<[1], [0], [0], [1], [0, 0, 1, 1], [], []>} : vector<8x32xf32>, vector<32x128xf32>, vector<8x128xf32> -> vector<8x128xf32>
    %cst_40 = arith.constant dense<0.000000e+00> : vector<8x128xf32>
    %91 = tpu.matmul %66, %13, %cst_40 {dimension_numbers = #tpu.dot_dimension_numbers<[1], [0], [0], [1], [0, 0, 1, 1], [], []>} : vector<8x32xf32>, vector<32x128xf32>, vector<8x128xf32> -> vector<8x128xf32>
    %92 = arith.addf %90, %91 : vector<8x128xf32>
    %93 = vector.broadcast %14 : vector<1x128xf32> to vector<8x128xf32>
    %94 = arith.addf %92, %93 : vector<8x128xf32>
    %95 = arith.negf %94 : vector<8x128xf32>
    %96 = math.exp %95 : vector<8x128xf32>
    %cst_41 = arith.constant 1.000000e+00 : f32
    %97 = vector.broadcast %cst_41 : f32 to vector<8x128xf32>
    %98 = arith.addf %97, %96 : vector<8x128xf32>
    %99 = arith.divf %97, %98 : vector<8x128xf32>
    %100 = vector.extract_strided_slice %99 {offsets = [0, 0], sizes = [8, 32], strides = [1, 1]} : vector<8x128xf32> to vector<8x32xf32>
    %101 = vector.extract_strided_slice %99 {offsets = [0, 32], sizes = [8, 32], strides = [1, 1]} : vector<8x128xf32> to vector<8x32xf32>
    %102 = vector.extract_strided_slice %99 {offsets = [0, 64], sizes = [8, 32], strides = [1, 1]} : vector<8x128xf32> to vector<8x32xf32>
    %cst_42 = arith.constant 2.000000e+00 : f32
    %103 = vector.broadcast %cst_42 : f32 to vector<8x32xf32>
    %104 = arith.mulf %103, %102 : vector<8x32xf32>
    %cst_43 = arith.constant 1.000000e+00 : f32
    %105 = vector.broadcast %cst_43 : f32 to vector<8x32xf32>
    %106 = arith.subf %104, %105 : vector<8x32xf32>
    %107 = vector.extract_strided_slice %99 {offsets = [0, 96], sizes = [8, 32], strides = [1, 1]} : vector<8x128xf32> to vector<8x32xf32>
    %108 = arith.mulf %101, %64 : vector<8x32xf32>
    %109 = arith.mulf %100, %106 : vector<8x32xf32>
    %110 = arith.addf %108, %109 : vector<8x32xf32>
    %111 = math.tanh %110 : vector<8x32xf32>
    %112 = arith.mulf %107, %111 : vector<8x32xf32>
    %113 = vector.extract_strided_slice %112 {offsets = [7, 0], sizes = [1, 32], strides = [1, 1]} : vector<8x32xf32> to vector<1x32xf32>
    %c1_44 = arith.constant 1 : index
    %c0_45 = arith.constant 0 : index
    %114 = vector.load %arg15[%c1_44, %c0_45] : memref<8x32xf32, #tpu.memory_space<vmem>>, vector<1x32xf32>
    tpu.vector_store %arg15[%c1_44, %c0_45], %113 {strides = array<i32>} : memref<8x32xf32, #tpu.memory_space<vmem>>, vector<1x32xf32>,
    %115 = vector.extract_strided_slice %10 {offsets = [16, 0], sizes = [8, 128], strides = [1, 1]} : vector<64x128xf32> to vector<8x128xf32>
    %cst_46 = arith.constant dense<0.000000e+00> : vector<8x128xf32>
    %116 = tpu.matmul %89, %11, %cst_46 {dimension_numbers = #tpu.dot_dimension_numbers<[1], [0], [0], [1], [0, 0, 1, 1], [], []>} : vector<8x32xf32>, vector<32x128xf32>, vector<8x128xf32> -> vector<8x128xf32>
    %117 = arith.addf %115, %116 : vector<8x128xf32>
    %118 = arith.negf %117 : vector<8x128xf32>
    %119 = math.exp %118 : vector<8x128xf32>
    %cst_47 = arith.constant 1.000000e+00 : f32
    %120 = vector.broadcast %cst_47 : f32 to vector<8x128xf32>
    %121 = arith.addf %120, %119 : vector<8x128xf32>
    %122 = arith.divf %120, %121 : vector<8x128xf32>
    %123 = vector.extract_strided_slice %122 {offsets = [0, 0], sizes = [8, 32], strides = [1, 1]} : vector<8x128xf32> to vector<8x32xf32>
    %124 = vector.extract_strided_slice %122 {offsets = [0, 32], sizes = [8, 32], strides = [1, 1]} : vector<8x128xf32> to vector<8x32xf32>
    %125 = vector.extract_strided_slice %122 {offsets = [0, 64], sizes = [8, 32], strides = [1, 1]} : vector<8x128xf32> to vector<8x32xf32>
    %cst_48 = arith.constant 2.000000e+00 : f32
    %126 = vector.broadcast %cst_48 : f32 to vector<8x32xf32>
    %127 = arith.mulf %126, %125 : vector<8x32xf32>
    %cst_49 = arith.constant 1.000000e+00 : f32
    %128 = vector.broadcast %cst_49 : f32 to vector<8x32xf32>
    %129 = arith.subf %127, %128 : vector<8x32xf32>
    %130 = vector.extract_strided_slice %122 {offsets = [0, 96], sizes = [8, 32], strides = [1, 1]} : vector<8x128xf32> to vector<8x32xf32>
    %131 = arith.mulf %124, %87 : vector<8x32xf32>
    %132 = arith.mulf %123, %129 : vector<8x32xf32>
    %133 = arith.addf %131, %132 : vector<8x32xf32>
    %134 = math.tanh %133 : vector<8x32xf32>
    %135 = arith.mulf %130, %134 : vector<8x32xf32>
    %cst_50 = arith.constant dense<0.000000e+00> : vector<8x128xf32>
    %136 = tpu.matmul %135, %12, %cst_50 {dimension_numbers = #tpu.dot_dimension_numbers<[1], [0], [0], [1], [0, 0, 1, 1], [], []>} : vector<8x32xf32>, vector<32x128xf32>, vector<8x128xf32> -> vector<8x128xf32>
    %cst_51 = arith.constant dense<0.000000e+00> : vector<8x128xf32>
    %137 = tpu.matmul %112, %13, %cst_51 {dimension_numbers = #tpu.dot_dimension_numbers<[1], [0], [0], [1], [0, 0, 1, 1], [], []>} : vector<8x32xf32>, vector<32x128xf32>, vector<8x128xf32> -> vector<8x128xf32>
    %138 = arith.addf %136, %137 : vector<8x128xf32>
    %139 = vector.broadcast %14 : vector<1x128xf32> to vector<8x128xf32>
    %140 = arith.addf %138, %139 : vector<8x128xf32>
    %141 = arith.negf %140 : vector<8x128xf32>
    %142 = math.exp %141 : vector<8x128xf32>
    %cst_52 = arith.constant 1.000000e+00 : f32
    %143 = vector.broadcast %cst_52 : f32 to vector<8x128xf32>
    %144 = arith.addf %143, %142 : vector<8x128xf32>
    %145 = arith.divf %143, %144 : vector<8x128xf32>
    %146 = vector.extract_strided_slice %145 {offsets = [0, 0], sizes = [8, 32], strides = [1, 1]} : vector<8x128xf32> to vector<8x32xf32>
    %147 = vector.extract_strided_slice %145 {offsets = [0, 32], sizes = [8, 32], strides = [1, 1]} : vector<8x128xf32> to vector<8x32xf32>
    %148 = vector.extract_strided_slice %145 {offsets = [0, 64], sizes = [8, 32], strides = [1, 1]} : vector<8x128xf32> to vector<8x32xf32>
    %cst_53 = arith.constant 2.000000e+00 : f32
    %149 = vector.broadcast %cst_53 : f32 to vector<8x32xf32>
    %150 = arith.mulf %149, %148 : vector<8x32xf32>
    %cst_54 = arith.constant 1.000000e+00 : f32
    %151 = vector.broadcast %cst_54 : f32 to vector<8x32xf32>
    %152 = arith.subf %150, %151 : vector<8x32xf32>
    %153 = vector.extract_strided_slice %145 {offsets = [0, 96], sizes = [8, 32], strides = [1, 1]} : vector<8x128xf32> to vector<8x32xf32>
    %154 = arith.mulf %147, %110 : vector<8x32xf32>
    %155 = arith.mulf %146, %152 : vector<8x32xf32>
    %156 = arith.addf %154, %155 : vector<8x32xf32>
    %157 = math.tanh %156 : vector<8x32xf32>
    %158 = arith.mulf %153, %157 : vector<8x32xf32>
    %159 = vector.extract_strided_slice %158 {offsets = [7, 0], sizes = [1, 32], strides = [1, 1]} : vector<8x32xf32> to vector<1x32xf32>
    %c2 = arith.constant 2 : index
    %c0_55 = arith.constant 0 : index
    %160 = vector.load %arg15[%c2, %c0_55] : memref<8x32xf32, #tpu.memory_space<vmem>>, vector<1x32xf32>
    tpu.vector_store %arg15[%c2, %c0_55], %159 {strides = array<i32>} : memref<8x32xf32, #tpu.memory_space<vmem>>, vector<1x32xf32>,
    %161 = vector.extract_strided_slice %10 {offsets = [24, 0], sizes = [8, 128], strides = [1, 1]} : vector<64x128xf32> to vector<8x128xf32>
    %cst_56 = arith.constant dense<0.000000e+00> : vector<8x128xf32>
    %162 = tpu.matmul %135, %11, %cst_56 {dimension_numbers = #tpu.dot_dimension_numbers<[1], [0], [0], [1], [0, 0, 1, 1], [], []>} : vector<8x32xf32>, vector<32x128xf32>, vector<8x128xf32> -> vector<8x128xf32>
    %163 = arith.addf %161, %162 : vector<8x128xf32>
    %164 = arith.negf %163 : vector<8x128xf32>
    %165 = math.exp %164 : vector<8x128xf32>
    %cst_57 = arith.constant 1.000000e+00 : f32
    %166 = vector.broadcast %cst_57 : f32 to vector<8x128xf32>
    %167 = arith.addf %166, %165 : vector<8x128xf32>
    %168 = arith.divf %166, %167 : vector<8x128xf32>
    %169 = vector.extract_strided_slice %168 {offsets = [0, 0], sizes = [8, 32], strides = [1, 1]} : vector<8x128xf32> to vector<8x32xf32>
    %170 = vector.extract_strided_slice %168 {offsets = [0, 32], sizes = [8, 32], strides = [1, 1]} : vector<8x128xf32> to vector<8x32xf32>
    %171 = vector.extract_strided_slice %168 {offsets = [0, 64], sizes = [8, 32], strides = [1, 1]} : vector<8x128xf32> to vector<8x32xf32>
    %cst_58 = arith.constant 2.000000e+00 : f32
    %172 = vector.broadcast %cst_58 : f32 to vector<8x32xf32>
    %173 = arith.mulf %172, %171 : vector<8x32xf32>
    %cst_59 = arith.constant 1.000000e+00 : f32
    %174 = vector.broadcast %cst_59 : f32 to vector<8x32xf32>
    %175 = arith.subf %173, %174 : vector<8x32xf32>
    %176 = vector.extract_strided_slice %168 {offsets = [0, 96], sizes = [8, 32], strides = [1, 1]} : vector<8x128xf32> to vector<8x32xf32>
    %177 = arith.mulf %170, %133 : vector<8x32xf32>
    %178 = arith.mulf %169, %175 : vector<8x32xf32>
    %179 = arith.addf %177, %178 : vector<8x32xf32>
    %180 = math.tanh %179 : vector<8x32xf32>
    %181 = arith.mulf %176, %180 : vector<8x32xf32>
    %cst_60 = arith.constant dense<0.000000e+00> : vector<8x128xf32>
    %182 = tpu.matmul %181, %12, %cst_60 {dimension_numbers = #tpu.dot_dimension_numbers<[1], [0], [0], [1], [0, 0, 1, 1], [], []>} : vector<8x32xf32>, vector<32x128xf32>, vector<8x128xf32> -> vector<8x128xf32>
    %cst_61 = arith.constant dense<0.000000e+00> : vector<8x128xf32>
    %183 = tpu.matmul %158, %13, %cst_61 {dimension_numbers = #tpu.dot_dimension_numbers<[1], [0], [0], [1], [0, 0, 1, 1], [], []>} : vector<8x32xf32>, vector<32x128xf32>, vector<8x128xf32> -> vector<8x128xf32>
    %184 = arith.addf %182, %183 : vector<8x128xf32>
    %185 = vector.broadcast %14 : vector<1x128xf32> to vector<8x128xf32>
    %186 = arith.addf %184, %185 : vector<8x128xf32>
    %187 = arith.negf %186 : vector<8x128xf32>
    %188 = math.exp %187 : vector<8x128xf32>
    %cst_62 = arith.constant 1.000000e+00 : f32
    %189 = vector.broadcast %cst_62 : f32 to vector<8x128xf32>
    %190 = arith.addf %189, %188 : vector<8x128xf32>
    %191 = arith.divf %189, %190 : vector<8x128xf32>
    %192 = vector.extract_strided_slice %191 {offsets = [0, 0], sizes = [8, 32], strides = [1, 1]} : vector<8x128xf32> to vector<8x32xf32>
    %193 = vector.extract_strided_slice %191 {offsets = [0, 32], sizes = [8, 32], strides = [1, 1]} : vector<8x128xf32> to vector<8x32xf32>
    %194 = vector.extract_strided_slice %191 {offsets = [0, 64], sizes = [8, 32], strides = [1, 1]} : vector<8x128xf32> to vector<8x32xf32>
    %cst_63 = arith.constant 2.000000e+00 : f32
    %195 = vector.broadcast %cst_63 : f32 to vector<8x32xf32>
    %196 = arith.mulf %195, %194 : vector<8x32xf32>
    %cst_64 = arith.constant 1.000000e+00 : f32
    %197 = vector.broadcast %cst_64 : f32 to vector<8x32xf32>
    %198 = arith.subf %196, %197 : vector<8x32xf32>
    %199 = vector.extract_strided_slice %191 {offsets = [0, 96], sizes = [8, 32], strides = [1, 1]} : vector<8x128xf32> to vector<8x32xf32>
    %200 = arith.mulf %193, %156 : vector<8x32xf32>
    %201 = arith.mulf %192, %198 : vector<8x32xf32>
    %202 = arith.addf %200, %201 : vector<8x32xf32>
    %203 = math.tanh %202 : vector<8x32xf32>
    %204 = arith.mulf %199, %203 : vector<8x32xf32>
    %205 = vector.extract_strided_slice %204 {offsets = [7, 0], sizes = [1, 32], strides = [1, 1]} : vector<8x32xf32> to vector<1x32xf32>
    %c3 = arith.constant 3 : index
    %c0_65 = arith.constant 0 : index
    %206 = vector.load %arg15[%c3, %c0_65] : memref<8x32xf32, #tpu.memory_space<vmem>>, vector<1x32xf32>
    tpu.vector_store %arg15[%c3, %c0_65], %205 {strides = array<i32>} : memref<8x32xf32, #tpu.memory_space<vmem>>, vector<1x32xf32>,
    %207 = vector.extract_strided_slice %10 {offsets = [32, 0], sizes = [8, 128], strides = [1, 1]} : vector<64x128xf32> to vector<8x128xf32>
    %cst_66 = arith.constant dense<0.000000e+00> : vector<8x128xf32>
    %208 = tpu.matmul %181, %11, %cst_66 {dimension_numbers = #tpu.dot_dimension_numbers<[1], [0], [0], [1], [0, 0, 1, 1], [], []>} : vector<8x32xf32>, vector<32x128xf32>, vector<8x128xf32> -> vector<8x128xf32>
    %209 = arith.addf %207, %208 : vector<8x128xf32>
    %210 = arith.negf %209 : vector<8x128xf32>
    %211 = math.exp %210 : vector<8x128xf32>
    %cst_67 = arith.constant 1.000000e+00 : f32
    %212 = vector.broadcast %cst_67 : f32 to vector<8x128xf32>
    %213 = arith.addf %212, %211 : vector<8x128xf32>
    %214 = arith.divf %212, %213 : vector<8x128xf32>
    %215 = vector.extract_strided_slice %214 {offsets = [0, 0], sizes = [8, 32], strides = [1, 1]} : vector<8x128xf32> to vector<8x32xf32>
    %216 = vector.extract_strided_slice %214 {offsets = [0, 32], sizes = [8, 32], strides = [1, 1]} : vector<8x128xf32> to vector<8x32xf32>
    %217 = vector.extract_strided_slice %214 {offsets = [0, 64], sizes = [8, 32], strides = [1, 1]} : vector<8x128xf32> to vector<8x32xf32>
    %cst_68 = arith.constant 2.000000e+00 : f32
    %218 = vector.broadcast %cst_68 : f32 to vector<8x32xf32>
    %219 = arith.mulf %218, %217 : vector<8x32xf32>
    %cst_69 = arith.constant 1.000000e+00 : f32
    %220 = vector.broadcast %cst_69 : f32 to vector<8x32xf32>
    %221 = arith.subf %219, %220 : vector<8x32xf32>
    %222 = vector.extract_strided_slice %214 {offsets = [0, 96], sizes = [8, 32], strides = [1, 1]} : vector<8x128xf32> to vector<8x32xf32>
    %223 = arith.mulf %216, %179 : vector<8x32xf32>
    %224 = arith.mulf %215, %221 : vector<8x32xf32>
    %225 = arith.addf %223, %224 : vector<8x32xf32>
    %226 = math.tanh %225 : vector<8x32xf32>
    %227 = arith.mulf %222, %226 : vector<8x32xf32>
    %cst_70 = arith.constant dense<0.000000e+00> : vector<8x128xf32>
    %228 = tpu.matmul %227, %12, %cst_70 {dimension_numbers = #tpu.dot_dimension_numbers<[1], [0], [0], [1], [0, 0, 1, 1], [], []>} : vector<8x32xf32>, vector<32x128xf32>, vector<8x128xf32> -> vector<8x128xf32>
    %cst_71 = arith.constant dense<0.000000e+00> : vector<8x128xf32>
    %229 = tpu.matmul %204, %13, %cst_71 {dimension_numbers = #tpu.dot_dimension_numbers<[1], [0], [0], [1], [0, 0, 1, 1], [], []>} : vector<8x32xf32>, vector<32x128xf32>, vector<8x128xf32> -> vector<8x128xf32>
    %230 = arith.addf %228, %229 : vector<8x128xf32>
    %231 = vector.broadcast %14 : vector<1x128xf32> to vector<8x128xf32>
    %232 = arith.addf %230, %231 : vector<8x128xf32>
    %233 = arith.negf %232 : vector<8x128xf32>
    %234 = math.exp %233 : vector<8x128xf32>
    %cst_72 = arith.constant 1.000000e+00 : f32
    %235 = vector.broadcast %cst_72 : f32 to vector<8x128xf32>
    %236 = arith.addf %235, %234 : vector<8x128xf32>
    %237 = arith.divf %235, %236 : vector<8x128xf32>
    %238 = vector.extract_strided_slice %237 {offsets = [0, 0], sizes = [8, 32], strides = [1, 1]} : vector<8x128xf32> to vector<8x32xf32>
    %239 = vector.extract_strided_slice %237 {offsets = [0, 32], sizes = [8, 32], strides = [1, 1]} : vector<8x128xf32> to vector<8x32xf32>
    %240 = vector.extract_strided_slice %237 {offsets = [0, 64], sizes = [8, 32], strides = [1, 1]} : vector<8x128xf32> to vector<8x32xf32>
    %cst_73 = arith.constant 2.000000e+00 : f32
    %241 = vector.broadcast %cst_73 : f32 to vector<8x32xf32>
    %242 = arith.mulf %241, %240 : vector<8x32xf32>
    %cst_74 = arith.constant 1.000000e+00 : f32
    %243 = vector.broadcast %cst_74 : f32 to vector<8x32xf32>
    %244 = arith.subf %242, %243 : vector<8x32xf32>
    %245 = vector.extract_strided_slice %237 {offsets = [0, 96], sizes = [8, 32], strides = [1, 1]} : vector<8x128xf32> to vector<8x32xf32>
    %246 = arith.mulf %239, %202 : vector<8x32xf32>
    %247 = arith.mulf %238, %244 : vector<8x32xf32>
    %248 = arith.addf %246, %247 : vector<8x32xf32>
    %249 = math.tanh %248 : vector<8x32xf32>
    %250 = arith.mulf %245, %249 : vector<8x32xf32>
    %251 = vector.extract_strided_slice %250 {offsets = [7, 0], sizes = [1, 32], strides = [1, 1]} : vector<8x32xf32> to vector<1x32xf32>
    %c4 = arith.constant 4 : index
    %c0_75 = arith.constant 0 : index
    %252 = vector.load %arg15[%c4, %c0_75] : memref<8x32xf32, #tpu.memory_space<vmem>>, vector<1x32xf32>
    tpu.vector_store %arg15[%c4, %c0_75], %251 {strides = array<i32>} : memref<8x32xf32, #tpu.memory_space<vmem>>, vector<1x32xf32>,
    %253 = vector.extract_strided_slice %10 {offsets = [40, 0], sizes = [8, 128], strides = [1, 1]} : vector<64x128xf32> to vector<8x128xf32>
    %cst_76 = arith.constant dense<0.000000e+00> : vector<8x128xf32>
    %254 = tpu.matmul %227, %11, %cst_76 {dimension_numbers = #tpu.dot_dimension_numbers<[1], [0], [0], [1], [0, 0, 1, 1], [], []>} : vector<8x32xf32>, vector<32x128xf32>, vector<8x128xf32> -> vector<8x128xf32>
    %255 = arith.addf %253, %254 : vector<8x128xf32>
    %256 = arith.negf %255 : vector<8x128xf32>
    %257 = math.exp %256 : vector<8x128xf32>
    %cst_77 = arith.constant 1.000000e+00 : f32
    %258 = vector.broadcast %cst_77 : f32 to vector<8x128xf32>
    %259 = arith.addf %258, %257 : vector<8x128xf32>
    %260 = arith.divf %258, %259 : vector<8x128xf32>
    %261 = vector.extract_strided_slice %260 {offsets = [0, 0], sizes = [8, 32], strides = [1, 1]} : vector<8x128xf32> to vector<8x32xf32>
    %262 = vector.extract_strided_slice %260 {offsets = [0, 32], sizes = [8, 32], strides = [1, 1]} : vector<8x128xf32> to vector<8x32xf32>
    %263 = vector.extract_strided_slice %260 {offsets = [0, 64], sizes = [8, 32], strides = [1, 1]} : vector<8x128xf32> to vector<8x32xf32>
    %cst_78 = arith.constant 2.000000e+00 : f32
    %264 = vector.broadcast %cst_78 : f32 to vector<8x32xf32>
    %265 = arith.mulf %264, %263 : vector<8x32xf32>
    %cst_79 = arith.constant 1.000000e+00 : f32
    %266 = vector.broadcast %cst_79 : f32 to vector<8x32xf32>
    %267 = arith.subf %265, %266 : vector<8x32xf32>
    %268 = vector.extract_strided_slice %260 {offsets = [0, 96], sizes = [8, 32], strides = [1, 1]} : vector<8x128xf32> to vector<8x32xf32>
    %269 = arith.mulf %262, %225 : vector<8x32xf32>
    %270 = arith.mulf %261, %267 : vector<8x32xf32>
    %271 = arith.addf %269, %270 : vector<8x32xf32>
    %272 = math.tanh %271 : vector<8x32xf32>
    %273 = arith.mulf %268, %272 : vector<8x32xf32>
    %cst_80 = arith.constant dense<0.000000e+00> : vector<8x128xf32>
    %274 = tpu.matmul %273, %12, %cst_80 {dimension_numbers = #tpu.dot_dimension_numbers<[1], [0], [0], [1], [0, 0, 1, 1], [], []>} : vector<8x32xf32>, vector<32x128xf32>, vector<8x128xf32> -> vector<8x128xf32>
    %cst_81 = arith.constant dense<0.000000e+00> : vector<8x128xf32>
    %275 = tpu.matmul %250, %13, %cst_81 {dimension_numbers = #tpu.dot_dimension_numbers<[1], [0], [0], [1], [0, 0, 1, 1], [], []>} : vector<8x32xf32>, vector<32x128xf32>, vector<8x128xf32> -> vector<8x128xf32>
    %276 = arith.addf %274, %275 : vector<8x128xf32>
    %277 = vector.broadcast %14 : vector<1x128xf32> to vector<8x128xf32>
    %278 = arith.addf %276, %277 : vector<8x128xf32>
    %279 = arith.negf %278 : vector<8x128xf32>
    %280 = math.exp %279 : vector<8x128xf32>
    %cst_82 = arith.constant 1.000000e+00 : f32
    %281 = vector.broadcast %cst_82 : f32 to vector<8x128xf32>
    %282 = arith.addf %281, %280 : vector<8x128xf32>
    %283 = arith.divf %281, %282 : vector<8x128xf32>
    %284 = vector.extract_strided_slice %283 {offsets = [0, 0], sizes = [8, 32], strides = [1, 1]} : vector<8x128xf32> to vector<8x32xf32>
    %285 = vector.extract_strided_slice %283 {offsets = [0, 32], sizes = [8, 32], strides = [1, 1]} : vector<8x128xf32> to vector<8x32xf32>
    %286 = vector.extract_strided_slice %283 {offsets = [0, 64], sizes = [8, 32], strides = [1, 1]} : vector<8x128xf32> to vector<8x32xf32>
    %cst_83 = arith.constant 2.000000e+00 : f32
    %287 = vector.broadcast %cst_83 : f32 to vector<8x32xf32>
    %288 = arith.mulf %287, %286 : vector<8x32xf32>
    %cst_84 = arith.constant 1.000000e+00 : f32
    %289 = vector.broadcast %cst_84 : f32 to vector<8x32xf32>
    %290 = arith.subf %288, %289 : vector<8x32xf32>
    %291 = vector.extract_strided_slice %283 {offsets = [0, 96], sizes = [8, 32], strides = [1, 1]} : vector<8x128xf32> to vector<8x32xf32>
    %292 = arith.mulf %285, %248 : vector<8x32xf32>
    %293 = arith.mulf %284, %290 : vector<8x32xf32>
    %294 = arith.addf %292, %293 : vector<8x32xf32>
    %295 = math.tanh %294 : vector<8x32xf32>
    %296 = arith.mulf %291, %295 : vector<8x32xf32>
    %297 = vector.extract_strided_slice %296 {offsets = [7, 0], sizes = [1, 32], strides = [1, 1]} : vector<8x32xf32> to vector<1x32xf32>
    %c5 = arith.constant 5 : index
    %c0_85 = arith.constant 0 : index
    %298 = vector.load %arg15[%c5, %c0_85] : memref<8x32xf32, #tpu.memory_space<vmem>>, vector<1x32xf32>
    tpu.vector_store %arg15[%c5, %c0_85], %297 {strides = array<i32>} : memref<8x32xf32, #tpu.memory_space<vmem>>, vector<1x32xf32>,
    %299 = vector.extract_strided_slice %10 {offsets = [48, 0], sizes = [8, 128], strides = [1, 1]} : vector<64x128xf32> to vector<8x128xf32>
    %cst_86 = arith.constant dense<0.000000e+00> : vector<8x128xf32>
    %300 = tpu.matmul %273, %11, %cst_86 {dimension_numbers = #tpu.dot_dimension_numbers<[1], [0], [0], [1], [0, 0, 1, 1], [], []>} : vector<8x32xf32>, vector<32x128xf32>, vector<8x128xf32> -> vector<8x128xf32>
    %301 = arith.addf %299, %300 : vector<8x128xf32>
    %302 = arith.negf %301 : vector<8x128xf32>
    %303 = math.exp %302 : vector<8x128xf32>
    %cst_87 = arith.constant 1.000000e+00 : f32
    %304 = vector.broadcast %cst_87 : f32 to vector<8x128xf32>
    %305 = arith.addf %304, %303 : vector<8x128xf32>
    %306 = arith.divf %304, %305 : vector<8x128xf32>
    %307 = vector.extract_strided_slice %306 {offsets = [0, 0], sizes = [8, 32], strides = [1, 1]} : vector<8x128xf32> to vector<8x32xf32>
    %308 = vector.extract_strided_slice %306 {offsets = [0, 32], sizes = [8, 32], strides = [1, 1]} : vector<8x128xf32> to vector<8x32xf32>
    %309 = vector.extract_strided_slice %306 {offsets = [0, 64], sizes = [8, 32], strides = [1, 1]} : vector<8x128xf32> to vector<8x32xf32>
    %cst_88 = arith.constant 2.000000e+00 : f32
    %310 = vector.broadcast %cst_88 : f32 to vector<8x32xf32>
    %311 = arith.mulf %310, %309 : vector<8x32xf32>
    %cst_89 = arith.constant 1.000000e+00 : f32
    %312 = vector.broadcast %cst_89 : f32 to vector<8x32xf32>
    %313 = arith.subf %311, %312 : vector<8x32xf32>
    %314 = vector.extract_strided_slice %306 {offsets = [0, 96], sizes = [8, 32], strides = [1, 1]} : vector<8x128xf32> to vector<8x32xf32>
    %315 = arith.mulf %308, %271 : vector<8x32xf32>
    %316 = arith.mulf %307, %313 : vector<8x32xf32>
    %317 = arith.addf %315, %316 : vector<8x32xf32>
    %318 = math.tanh %317 : vector<8x32xf32>
    %319 = arith.mulf %314, %318 : vector<8x32xf32>
    %cst_90 = arith.constant dense<0.000000e+00> : vector<8x128xf32>
    %320 = tpu.matmul %319, %12, %cst_90 {dimension_numbers = #tpu.dot_dimension_numbers<[1], [0], [0], [1], [0, 0, 1, 1], [], []>} : vector<8x32xf32>, vector<32x128xf32>, vector<8x128xf32> -> vector<8x128xf32>
    %cst_91 = arith.constant dense<0.000000e+00> : vector<8x128xf32>
    %321 = tpu.matmul %296, %13, %cst_91 {dimension_numbers = #tpu.dot_dimension_numbers<[1], [0], [0], [1], [0, 0, 1, 1], [], []>} : vector<8x32xf32>, vector<32x128xf32>, vector<8x128xf32> -> vector<8x128xf32>
    %322 = arith.addf %320, %321 : vector<8x128xf32>
    %323 = vector.broadcast %14 : vector<1x128xf32> to vector<8x128xf32>
    %324 = arith.addf %322, %323 : vector<8x128xf32>
    %325 = arith.negf %324 : vector<8x128xf32>
    %326 = math.exp %325 : vector<8x128xf32>
    %cst_92 = arith.constant 1.000000e+00 : f32
    %327 = vector.broadcast %cst_92 : f32 to vector<8x128xf32>
    %328 = arith.addf %327, %326 : vector<8x128xf32>
    %329 = arith.divf %327, %328 : vector<8x128xf32>
    %330 = vector.extract_strided_slice %329 {offsets = [0, 0], sizes = [8, 32], strides = [1, 1]} : vector<8x128xf32> to vector<8x32xf32>
    %331 = vector.extract_strided_slice %329 {offsets = [0, 32], sizes = [8, 32], strides = [1, 1]} : vector<8x128xf32> to vector<8x32xf32>
    %332 = vector.extract_strided_slice %329 {offsets = [0, 64], sizes = [8, 32], strides = [1, 1]} : vector<8x128xf32> to vector<8x32xf32>
    %cst_93 = arith.constant 2.000000e+00 : f32
    %333 = vector.broadcast %cst_93 : f32 to vector<8x32xf32>
    %334 = arith.mulf %333, %332 : vector<8x32xf32>
    %cst_94 = arith.constant 1.000000e+00 : f32
    %335 = vector.broadcast %cst_94 : f32 to vector<8x32xf32>
    %336 = arith.subf %334, %335 : vector<8x32xf32>
    %337 = vector.extract_strided_slice %329 {offsets = [0, 96], sizes = [8, 32], strides = [1, 1]} : vector<8x128xf32> to vector<8x32xf32>
    %338 = arith.mulf %331, %294 : vector<8x32xf32>
    %339 = arith.mulf %330, %336 : vector<8x32xf32>
    %340 = arith.addf %338, %339 : vector<8x32xf32>
    %341 = math.tanh %340 : vector<8x32xf32>
    %342 = arith.mulf %337, %341 : vector<8x32xf32>
    %343 = vector.extract_strided_slice %342 {offsets = [7, 0], sizes = [1, 32], strides = [1, 1]} : vector<8x32xf32> to vector<1x32xf32>
    %c6 = arith.constant 6 : index
    %c0_95 = arith.constant 0 : index
    %344 = vector.load %arg15[%c6, %c0_95] : memref<8x32xf32, #tpu.memory_space<vmem>>, vector<1x32xf32>
    tpu.vector_store %arg15[%c6, %c0_95], %343 {strides = array<i32>} : memref<8x32xf32, #tpu.memory_space<vmem>>, vector<1x32xf32>,
    %345 = vector.extract_strided_slice %10 {offsets = [56, 0], sizes = [8, 128], strides = [1, 1]} : vector<64x128xf32> to vector<8x128xf32>
    %cst_96 = arith.constant dense<0.000000e+00> : vector<8x128xf32>
    %346 = tpu.matmul %319, %11, %cst_96 {dimension_numbers = #tpu.dot_dimension_numbers<[1], [0], [0], [1], [0, 0, 1, 1], [], []>} : vector<8x32xf32>, vector<32x128xf32>, vector<8x128xf32> -> vector<8x128xf32>
    %347 = arith.addf %345, %346 : vector<8x128xf32>
    %348 = arith.negf %347 : vector<8x128xf32>
    %349 = math.exp %348 : vector<8x128xf32>
    %cst_97 = arith.constant 1.000000e+00 : f32
    %350 = vector.broadcast %cst_97 : f32 to vector<8x128xf32>
    %351 = arith.addf %350, %349 : vector<8x128xf32>
    %352 = arith.divf %350, %351 : vector<8x128xf32>
    %353 = vector.extract_strided_slice %352 {offsets = [0, 0], sizes = [8, 32], strides = [1, 1]} : vector<8x128xf32> to vector<8x32xf32>
    %354 = vector.extract_strided_slice %352 {offsets = [0, 32], sizes = [8, 32], strides = [1, 1]} : vector<8x128xf32> to vector<8x32xf32>
    %355 = vector.extract_strided_slice %352 {offsets = [0, 64], sizes = [8, 32], strides = [1, 1]} : vector<8x128xf32> to vector<8x32xf32>
    %cst_98 = arith.constant 2.000000e+00 : f32
    %356 = vector.broadcast %cst_98 : f32 to vector<8x32xf32>
    %357 = arith.mulf %356, %355 : vector<8x32xf32>
    %cst_99 = arith.constant 1.000000e+00 : f32
    %358 = vector.broadcast %cst_99 : f32 to vector<8x32xf32>
    %359 = arith.subf %357, %358 : vector<8x32xf32>
    %360 = vector.extract_strided_slice %352 {offsets = [0, 96], sizes = [8, 32], strides = [1, 1]} : vector<8x128xf32> to vector<8x32xf32>
    %361 = arith.mulf %354, %317 : vector<8x32xf32>
    %362 = arith.mulf %353, %359 : vector<8x32xf32>
    %363 = arith.addf %361, %362 : vector<8x32xf32>
    %364 = math.tanh %363 : vector<8x32xf32>
    %365 = arith.mulf %360, %364 : vector<8x32xf32>
    %cst_100 = arith.constant dense<0.000000e+00> : vector<8x128xf32>
    %366 = tpu.matmul %365, %12, %cst_100 {dimension_numbers = #tpu.dot_dimension_numbers<[1], [0], [0], [1], [0, 0, 1, 1], [], []>} : vector<8x32xf32>, vector<32x128xf32>, vector<8x128xf32> -> vector<8x128xf32>
    %cst_101 = arith.constant dense<0.000000e+00> : vector<8x128xf32>
    %367 = tpu.matmul %342, %13, %cst_101 {dimension_numbers = #tpu.dot_dimension_numbers<[1], [0], [0], [1], [0, 0, 1, 1], [], []>} : vector<8x32xf32>, vector<32x128xf32>, vector<8x128xf32> -> vector<8x128xf32>
    %368 = arith.addf %366, %367 : vector<8x128xf32>
    %369 = vector.broadcast %14 : vector<1x128xf32> to vector<8x128xf32>
    %370 = arith.addf %368, %369 : vector<8x128xf32>
    %371 = arith.negf %370 : vector<8x128xf32>
    %372 = math.exp %371 : vector<8x128xf32>
    %cst_102 = arith.constant 1.000000e+00 : f32
    %373 = vector.broadcast %cst_102 : f32 to vector<8x128xf32>
    %374 = arith.addf %373, %372 : vector<8x128xf32>
    %375 = arith.divf %373, %374 : vector<8x128xf32>
    %376 = vector.extract_strided_slice %375 {offsets = [0, 0], sizes = [8, 32], strides = [1, 1]} : vector<8x128xf32> to vector<8x32xf32>
    %377 = vector.extract_strided_slice %375 {offsets = [0, 32], sizes = [8, 32], strides = [1, 1]} : vector<8x128xf32> to vector<8x32xf32>
    %378 = vector.extract_strided_slice %375 {offsets = [0, 64], sizes = [8, 32], strides = [1, 1]} : vector<8x128xf32> to vector<8x32xf32>
    %cst_103 = arith.constant 2.000000e+00 : f32
    %379 = vector.broadcast %cst_103 : f32 to vector<8x32xf32>
    %380 = arith.mulf %379, %378 : vector<8x32xf32>
    %cst_104 = arith.constant 1.000000e+00 : f32
    %381 = vector.broadcast %cst_104 : f32 to vector<8x32xf32>
    %382 = arith.subf %380, %381 : vector<8x32xf32>
    %383 = vector.extract_strided_slice %375 {offsets = [0, 96], sizes = [8, 32], strides = [1, 1]} : vector<8x128xf32> to vector<8x32xf32>
    %384 = arith.mulf %377, %340 : vector<8x32xf32>
    %385 = arith.mulf %376, %382 : vector<8x32xf32>
    %386 = arith.addf %384, %385 : vector<8x32xf32>
    %387 = math.tanh %386 : vector<8x32xf32>
    %388 = arith.mulf %383, %387 : vector<8x32xf32>
    %389 = vector.extract_strided_slice %388 {offsets = [7, 0], sizes = [1, 32], strides = [1, 1]} : vector<8x32xf32> to vector<1x32xf32>
    %c7 = arith.constant 7 : index
    %c0_105 = arith.constant 0 : index
    %390 = vector.load %arg15[%c7, %c0_105] : memref<8x32xf32, #tpu.memory_space<vmem>>, vector<1x32xf32>
    tpu.vector_store %arg15[%c7, %c0_105], %389 {strides = array<i32>} : memref<8x32xf32, #tpu.memory_space<vmem>>, vector<1x32xf32>,
    %c0_106 = arith.constant 0 : index
    %c0_107 = arith.constant 0 : index
    %c0_108 = arith.constant 0 : index
    %391 = vector.load %arg13[%c0_106, %c0_107, %c0_108] : memref<2x8x32xf32, #tpu.memory_space<vmem>>, vector<1x8x32xf32>
    %392 = vector.shape_cast %391 : vector<1x8x32xf32> to vector<8x32xf32>
    %393 = vector.shape_cast %365 : vector<8x32xf32> to vector<1x8x32xf32>
    tpu.vector_store %arg13[%c0_106, %c0_107, %c0_108], %393 {strides = array<i32>} : memref<2x8x32xf32, #tpu.memory_space<vmem>>, vector<1x8x32xf32>,
    %c1_109 = arith.constant 1 : index
    %c0_110 = arith.constant 0 : index
    %c0_111 = arith.constant 0 : index
    %394 = vector.load %arg13[%c1_109, %c0_110, %c0_111] : memref<2x8x32xf32, #tpu.memory_space<vmem>>, vector<1x8x32xf32>
    %395 = vector.shape_cast %394 : vector<1x8x32xf32> to vector<8x32xf32>
    %396 = vector.shape_cast %388 : vector<8x32xf32> to vector<1x8x32xf32>
    tpu.vector_store %arg13[%c1_109, %c0_110, %c0_111], %396 {strides = array<i32>} : memref<2x8x32xf32, #tpu.memory_space<vmem>>, vector<1x8x32xf32>,
    %c0_112 = arith.constant 0 : index
    %c0_113 = arith.constant 0 : index
    %c0_114 = arith.constant 0 : index
    %397 = vector.load %arg14[%c0_112, %c0_113, %c0_114] : memref<2x8x32xf32, #tpu.memory_space<vmem>>, vector<1x8x32xf32>
    %398 = vector.shape_cast %397 : vector<1x8x32xf32> to vector<8x32xf32>
    %399 = vector.shape_cast %363 : vector<8x32xf32> to vector<1x8x32xf32>
    tpu.vector_store %arg14[%c0_112, %c0_113, %c0_114], %399 {strides = array<i32>} : memref<2x8x32xf32, #tpu.memory_space<vmem>>, vector<1x8x32xf32>,
    %c1_115 = arith.constant 1 : index
    %c0_116 = arith.constant 0 : index
    %c0_117 = arith.constant 0 : index
    %400 = vector.load %arg14[%c1_115, %c0_116, %c0_117] : memref<2x8x32xf32, #tpu.memory_space<vmem>>, vector<1x8x32xf32>
    %401 = vector.shape_cast %400 : vector<1x8x32xf32> to vector<8x32xf32>
    %402 = vector.shape_cast %386 : vector<8x32xf32> to vector<1x8x32xf32>
    tpu.vector_store %arg14[%c1_115, %c0_116, %c0_117], %402 {strides = array<i32>} : memref<2x8x32xf32, #tpu.memory_space<vmem>>, vector<1x8x32xf32>,
    %c0_118 = arith.constant 0 : index
    %c0_119 = arith.constant 0 : index
    %403 = vector.load %arg15[%c0_118, %c0_119] : memref<8x32xf32, #tpu.memory_space<vmem>>, vector<8x32xf32>
    %cst_120 = arith.constant 0.000000e+00 : f32
    %404 = vector.broadcast %cst_120 : f32 to vector<8x32xf32>
    %405 = arith.cmpf ogt, %403, %404 : vector<8x32xf32>
    %cst_121 = arith.constant 1.000000e-01 : f32
    %406 = vector.broadcast %cst_121 : f32 to vector<8x32xf32>
    %407 = arith.mulf %406, %403 : vector<8x32xf32>
    %408 = arith.select %405, %403, %407 : vector<8x32xi1>, vector<8x32xf32>
    %c0_122 = arith.constant 0 : index
    %c0_123 = arith.constant 0 : index
    %409 = vector.load %arg8[%c0_122, %c0_123] : memref<32x256xf32, #tpu.memory_space<vmem>>, vector<32x256xf32>
    %cst_124 = arith.constant dense<0.000000e+00> : vector<8x256xf32>
    %410 = tpu.matmul %408, %409, %cst_124 {dimension_numbers = #tpu.dot_dimension_numbers<[1], [0], [0], [1], [0, 0, 1, 1], [], []>} : vector<8x32xf32>, vector<32x256xf32>, vector<8x256xf32> -> vector<8x256xf32>
    %c0_125 = arith.constant 0 : index
    %c0_126 = arith.constant 0 : index
    %411 = vector.load %arg9[%c0_125, %c0_126] : memref<1x256xf32, #tpu.memory_space<vmem>>, vector<1x256xf32>
    %412 = vector.broadcast %411 : vector<1x256xf32> to vector<8x256xf32>
    %413 = arith.addf %410, %412 : vector<8x256xf32>
    %cst_127 = arith.constant dense<0xFF800000> : vector<8xf32>
    %414 = vector.multi_reduction <maximumf>, %413, %cst_127 [1] : vector<8x256xf32> to vector<8xf32>
    %415 = vector.shape_cast %414 : vector<8xf32> to vector<8x1xf32>
    %416 = vector.broadcast %415 : vector<8x1xf32> to vector<8x256xf32>
    %417 = arith.subf %413, %416 : vector<8x256xf32>
    %418 = math.exp %417 : vector<8x256xf32>
    %cst_128 = arith.constant dense<0.000000e+00> : vector<8xf32>
    %419 = vector.multi_reduction <add>, %418, %cst_128 [1] : vector<8x256xf32> to vector<8xf32>
    %420 = vector.shape_cast %419 : vector<8xf32> to vector<8x1xf32>
    %421 = tpu.reciprocal %420 : vector<8x1xf32> -> vector<8x1xf32>
    %422 = vector.broadcast %421 : vector<8x1xf32> to vector<8x256xf32>
    %423 = arith.mulf %418, %422 : vector<8x256xf32>
    %c0_129 = arith.constant 0 : index
    %c0_130 = arith.constant 0 : index
    %424 = vector.load %arg12[%c0_129, %c0_130] : memref<8x256xf32, #tpu.memory_space<vmem>>, vector<8x256xf32>
    tpu.vector_store %arg12[%c0_129, %c0_130], %423 {strides = array<i32>} : memref<8x256xf32, #tpu.memory_space<vmem>>, vector<8x256xf32>,
    return
  }
  func.func @transform_0(%arg0: i32) -> (i32, i32) {
    %c0_i32 = arith.constant 0 : i32
    %c0_i32_0 = arith.constant 0 : i32
    %c0_i32_1 = arith.constant 0 : i32
    return %c0_i32, %c0_i32_0 : i32, i32
  }
  func.func @transform_1(%arg0: i32) -> (i32, i32) {
    %c0_i32 = arith.constant 0 : i32
    %c0_i32_0 = arith.constant 0 : i32
    %c0_i32_1 = arith.constant 0 : i32
    return %c0_i32, %c0_i32_0 : i32, i32
  }
  func.func @transform_2(%arg0: i32) -> (i32, i32) {
    %c0_i32 = arith.constant 0 : i32
    %c0_i32_0 = arith.constant 0 : i32
    %c0_i32_1 = arith.constant 0 : i32
    return %c0_i32, %c0_i32_0 : i32, i32
  }
  func.func @transform_3(%arg0: i32) -> (i32, i32) {
    %c0_i32 = arith.constant 0 : i32
    %c0_i32_0 = arith.constant 0 : i32
    %c0_i32_1 = arith.constant 0 : i32
    return %c0_i32, %c0_i32_0 : i32, i32
  }
  func.func @transform_4(%arg0: i32) -> (i32, i32) {
    %c0_i32 = arith.constant 0 : i32
    %c0_i32_0 = arith.constant 0 : i32
    %c0_i32_1 = arith.constant 0 : i32
    return %c0_i32, %c0_i32_0 : i32, i32
  }
  func.func @transform_5(%arg0: i32) -> (i32, i32) {
    %c0_i32 = arith.constant 0 : i32
    %c0_i32_0 = arith.constant 0 : i32
    %c0_i32_1 = arith.constant 0 : i32
    return %c0_i32, %c0_i32_0 : i32, i32
  }
  func.func @transform_6(%arg0: i32) -> (i32, i32) {
    %c0_i32 = arith.constant 0 : i32
    %c0_i32_0 = arith.constant 0 : i32
    %c0_i32_1 = arith.constant 0 : i32
    return %c0_i32, %c0_i32_0 : i32, i32
  }
  func.func @transform_7(%arg0: i32) -> (i32, i32) {
    %c0_i32 = arith.constant 0 : i32
    %c0_i32_0 = arith.constant 0 : i32
    %c0_i32_1 = arith.constant 0 : i32
    return %c0_i32, %c0_i32_0 : i32, i32
  }
  func.func @transform_8(%arg0: i32) -> (i32, i32) {
    %c0_i32 = arith.constant 0 : i32
    %c0_i32_0 = arith.constant 0 : i32
    %c0_i32_1 = arith.constant 0 : i32
    return %c0_i32, %c0_i32_0 : i32, i32
  }
  func.func @transform_9(%arg0: i32) -> (i32, i32, i32) {
    %c0_i32 = arith.constant 0 : i32
    %c0_i32_0 = arith.constant 0 : i32
    %c0_i32_1 = arith.constant 0 : i32
    %c0_i32_2 = arith.constant 0 : i32
    return %c0_i32, %c0_i32_0, %c0_i32_1 : i32, i32, i32
  }
  func.func @transform_10(%arg0: i32) -> (i32, i32, i32) {
    %c0_i32 = arith.constant 0 : i32
    %c0_i32_0 = arith.constant 0 : i32
    %c0_i32_1 = arith.constant 0 : i32
    %c0_i32_2 = arith.constant 0 : i32
    return %c0_i32, %c0_i32_0, %c0_i32_1 : i32, i32, i32
  }
  func.func @transform_11(%arg0: i32) -> (i32, i32) {
    %c0_i32 = arith.constant 0 : i32
    %c0_i32_0 = arith.constant 0 : i32
    %c0_i32_1 = arith.constant 0 : i32
    return %c0_i32, %c0_i32_0 : i32, i32
  }
  func.func @transform_12(%arg0: i32) -> (i32, i32, i32) {
    %c0_i32 = arith.constant 0 : i32
    %c0_i32_0 = arith.constant 0 : i32
    %c0_i32_1 = arith.constant 0 : i32
    %c0_i32_2 = arith.constant 0 : i32
    return %c0_i32, %c0_i32_0, %c0_i32_1 : i32, i32, i32
  }
  func.func @transform_13(%arg0: i32) -> (i32, i32, i32) {
    %c0_i32 = arith.constant 0 : i32
    %c0_i32_0 = arith.constant 0 : i32
    %c0_i32_1 = arith.constant 0 : i32
    %c0_i32_2 = arith.constant 0 : i32
    return %c0_i32, %c0_i32_0, %c0_i32_1 : i32, i32, i32
  }
}

</mosaic_0001>

<bundles_post_ra>
// kernel: tpu_custom_call.1
= control target key start
LH: loop header
LB: loop body
LE: loop exit
PB: predicated region body
PF: predicated region fallthrough
CT: control target
= control target key end

     0   :  { %19 = vsyncpa [#allocation4], 0  ;;  %s4445_s0 = inlined_call_operand.vmem [shape: s32[64,1], index: 0, kind: input, shape index: {}]   ;;  %s4446_s1 = inlined_call_operand.hbm [shape: f32[256,128], index: 1, kind: input, shape index: {}]   ;;  %s4447_s2 = inlined_call_operand.hbm [shape: f32[32,128], index: 2, kind: input, shape index: {}]   ;;  %s4448_s3 = inlined_call_operand.vmem [shape: f32[1,128], index: 3, kind: input, shape index: {}]   ;;  %s4449_s4 = inlined_call_operand.hbm [shape: f32[32,128], index: 4, kind: input, shape index: {}]   ;;  %s4450_s5 = inlined_call_operand.hbm [shape: f32[32,128], index: 5, kind: input, shape index: {}]   ;;  %s4451_s6 = inlined_call_operand.hbm [shape: f32[1,128], index: 6, kind: input, shape index: {}]   ;;  %s4452_s7 = inlined_call_operand.vmem [shape: f32[32,256], index: 7, kind: input, shape index: {}]   ;;  %s4453_s8 = inlined_call_operand.vmem [shape: f32[1,256], index: 8, kind: input, shape index: {}]   ;;  %s4454_s9 = inlined_call_operand.vmem [shape: f32[2,8,32], index: 9, kind: input, shape index: {}]   ;;  %s4455_s10 = inlined_call_operand.vmem [shape: f32[2,8,32], index: 10, kind: input, shape index: {}]   ;;  %s4456_s11 = inlined_call_operand.hbm [shape: f32[8,256], index: 11, kind: output, shape index: {0}]   ;;  %s4457_s12 = inlined_call_operand.hbm [shape: f32[2,8,32], index: 12, kind: output, shape index: {1}]   ;;  %s4458_s13 = inlined_call_operand.hbm [shape: f32[2,8,32], index: 13, kind: output, shape index: {2}]  }
   0x1   :  { %20 = vsyncpa [#allocation7], 0 }
   0x2   :  { %21 = vsyncpa [#allocation10], 0 }
   0x3   :  { %22 = vsyncpa [#allocation5], 0 }
   0x4   :  { %23 = vsyncpa [#allocation14], 0  ;;  %s3772_s25 = smov [#allocation6]   ;;  %s3773_s27 = smov [#allocation9]  }
   0x5   :  { %s43_s26 = sshll.u32 %s3772_s25, 4  ;;  %s69_s28 = sshll.u32 %s3773_s27, 4  ;;  %s44_s26 = int_to_ptr.vmem [resolvable:$true] %s43_s26  ;;  %s3860_s28 = int_to_ptr.vmem [resolvable:$true] %s69_s28 }
   0x6   :  { %s3586_s14 = scalar_lea.hbm %s4447_s2, 512 }
   0x7   :  { %p3587_p0 = scmp.ne.s32.totalorder %s4447_s2, %s3586_s14  ;;  %p3590_p1 = scmp.lt.u32.totalorder %s3586_s14, %s4447_s2 }
   0x9   :  { %p3592_p2 = pnand %p3590_p1, %p3587_p0 }
   0xb   :  { %3595 = shalt.err (!%p3592_p2)
}
   0xc   :  { %s3596_s19 = scalar_lea.vmem %s44_s26, 512  ;;  %p3601_p4 = scmp.lt.s32.totalorder %s44_s26, %s44_s26 }
   0xd   :  { %p3597_p3 = scmp.ne.s32.totalorder %s44_s26, %s3596_s19  ;;  %p3602_p5 = scmp.lt.s32.totalorder %s3596_s19, %s3596_s19 }
   0xf   :  { %p3603_p6 = por %p3602_p5, %p3601_p4 }
  0x11   :  { %p3604_p7 = pnand %p3603_p6, %p3597_p3 }
  0x13   :  { %3607 = shalt.err (!%p3604_p7)
}
  0x14   :  { %s3774_s20 = smov 128   ;;  %s3775_s21 = smov 8  }
  0x15   :  { %49 = dma.hbm_to_vmem [thread:$0]  %s4447_s2, 512, %s44_s26, [#allocation7], %s3774_s20, %s3774_s20, %s3775_s21  }
  0x16   :  { %s3608_s27 = scalar_lea.hbm %s4450_s5, 512 }
  0x17   :  { %p3609_p8 = scmp.ne.s32.totalorder %s4450_s5, %s3608_s27  ;;  %p3612_p9 = scmp.lt.u32.totalorder %s3608_s27, %s4450_s5 }
  0x19   :  { %p3614_p10 = pnand %p3612_p9, %p3609_p8 }
  0x1b   :  { %3617 = shalt.err (!%p3614_p10)
}
  0x1c   :  { %s3618_s16 = scalar_lea.vmem %s3860_s28, 512  ;;  %p3623_p12 = scmp.lt.s32.totalorder %s3860_s28, %s3860_s28 }
  0x1d   :  { %p3619_p11 = scmp.ne.s32.totalorder %s3860_s28, %s3618_s16  ;;  %p3624_p13 = scmp.lt.s32.totalorder %s3618_s16, %s3618_s16 }
  0x1f   :  { %p3625_p0 = por %p3624_p13, %p3623_p12 }
  0x21   :  { %p3626_p1 = pnand %p3625_p0, %p3619_p11 }
  0x23   :  { %3629 = shalt.err (!%p3626_p1)
}
  0x24   :  { %75 = dma.hbm_to_vmem [thread:$0]  %s4450_s5, 512, %s3860_s28, [#allocation10], %s3774_s20, %s3774_s20, %s3775_s21  }
  0x25   :  { %s3776_s17 = smov [#allocation3]   ;;  %s3777_s19 = smov [#allocation8]  }
  0x26   :  { %s31_s18 = sshll.u32 %s3776_s17, 4  ;;  %s57_s22 = sshll.u32 %s3777_s19, 4  ;;  %s32_s18 = int_to_ptr.vmem [resolvable:$true] %s31_s18  ;;  %s3897_s22 = int_to_ptr.vmem [resolvable:$true] %s57_s22 }
  0x27   :  { %s3630_s25 = scalar_lea.hbm %s4446_s1, 4096 }
  0x28   :  { %p3631_p2 = scmp.ne.s32.totalorder %s4446_s1, %s3630_s25  ;;  %p3634_p3 = scmp.lt.u32.totalorder %s3630_s25, %s4446_s1 }
  0x2a   :  { %p3636_p4 = pnand %p3634_p3, %p3631_p2 }
  0x2c   :  { %3639 = shalt.err (!%p3636_p4)
}
  0x2d   :  { %s3640_s5 = scalar_lea.vmem %s32_s18, 4096  ;;  %p3645_p6 = scmp.lt.s32.totalorder %s32_s18, %s32_s18 }
  0x2e   :  { %p3641_p5 = scmp.ne.s32.totalorder %s32_s18, %s3640_s5  ;;  %p3646_p7 = scmp.lt.s32.totalorder %s3640_s5, %s3640_s5 }
  0x30   :  { %p3647_p8 = por %p3646_p7, %p3645_p6 }
  0x32   :  { %p3648_p9 = pnand %p3647_p8, %p3641_p5 }
  0x34   :  { %3651 = shalt.err (!%p3648_p9)
}
  0x35   :  { %37 = dma.hbm_to_vmem [thread:$0]  %s4446_s1, 4096, %s32_s18, [#allocation4], %s3774_s20, %s3774_s20, %s3775_s21  }
  0x36   :  { %s3652_s26 = scalar_lea.hbm %s4449_s4, 512 }
  0x37   :  { %p3653_p10 = scmp.ne.s32.totalorder %s4449_s4, %s3652_s26  ;;  %p3656_p11 = scmp.lt.u32.totalorder %s3652_s26, %s4449_s4 }
  0x39   :  { %p3658_p12 = pnand %p3656_p11, %p3653_p10 }
  0x3b   :  { %3661 = shalt.err (!%p3658_p12)
}
  0x3c   :  { %s3662_s25 = scalar_lea.vmem %s3897_s22, 512  ;;  %p3667_p0 = scmp.lt.s32.totalorder %s3897_s22, %s3897_s22 }
  0x3d   :  { %p3663_p13 = scmp.ne.s32.totalorder %s3897_s22, %s3662_s25  ;;  %p3668_p1 = scmp.lt.s32.totalorder %s3662_s25, %s3662_s25 }
  0x3f   :  { %p3669_p2 = por %p3668_p1, %p3667_p0 }
  0x41   :  { %p3670_p3 = pnand %p3669_p2, %p3663_p13 }
  0x43   :  { %3673 = shalt.err (!%p3670_p3)
}
  0x44   :  { %63 = dma.hbm_to_vmem [thread:$0]  %s4449_s4, 512, %s3897_s22, [#allocation7], %s3774_s20, %s3774_s20, %s3775_s21  }
  0x45   :  { %s3778_s27 = smov [#allocation11]   ;;  %s3674_s5 = scalar_lea.hbm %s4451_s6, 16 }
  0x46   :  { %s82_s29 = sshll.u32 %s3778_s27, 4  ;;  %p3675_p4 = scmp.ne.s32.totalorder %s4451_s6, %s3674_s5  ;;  %s83_s29 = int_to_ptr.vmem [resolvable:$true] %s82_s29 }
  0x47   :  { %p3678_p5 = scmp.lt.u32.totalorder %s3674_s5, %s4451_s6 }
  0x49   :  { %p3680_p6 = pnand %p3678_p5, %p3675_p4 }
  0x4b   :  { %3683 = shalt.err (!%p3680_p6)
}
  0x4c   :  { %s3684_s26 = scalar_lea.vmem %s83_s29, 16  ;;  %s3688_s4 = scalar_lea.vmem %s83_s29, 32 }
  0x4d   :  { %p3685_p7 = scmp.ne.s32.totalorder %s83_s29, %s3684_s26  ;;  %p3689_p8 = scmp.lt.s32.totalorder %s83_s29, %s83_s29 }
  0x4e   :  { %p3690_p9 = scmp.lt.s32.totalorder %s3688_s4, %s3684_s26 }
  0x50   :  { %p3691_p10 = por %p3690_p9, %p3689_p8 }
  0x52   :  { %p3692_p11 = pnand %p3691_p10, %p3685_p7 }
  0x54   :  { %3695 = shalt.err (!%p3692_p11)
}
  0x55   :  { %85 = dma.hbm_to_vmem [thread:$0]  %s4451_s6, 16, %s83_s29, [#allocation10]  }
  0x56   :  { %3762 = dma.done.wait [#allocation4], 4096  }
  0x57   :  { %3763 = vsyncadd [#allocation4], 4294963200 }
  0x58   :  { %3764 = dma.done.wait [#allocation7], 1024  }
  0x59   :  { %3765 = vsyncadd [#allocation7], 4294966272 }
  0x5a   :  { %3766 = dma.done.wait [#allocation10], 528  }
  0x5b   :  { %3767 = vsyncadd [#allocation10], 4294966768  ;;  %v3779_v0 = vmov 0   ;;  %v3780_v1 = vmov 0.0|0.0   ;;  %v109_v2 = vld [vmem:[%s4445_s0] sm:$0xff]  ;;  %v208_v3 = vld [vmem:[#allocation3 + $0x80] sm:$0xff]  ;;  %v117_v60 = vlaneseq }
  0x5c   :  { %3480 = vset.pattern.permute.xlu0 %v3779_v0  ;;  %3310 = vmatprep.subr.bf16.mxu1 %v3780_v1  ;;  %v209_v4 = vld [vmem:[#allocation3 + $0x88] sm:$0xff]  ;;  %v192_v6 = vld [vmem:[#allocation3] sm:$0xff]  ;;  %v210_v8 = vld [vmem:[#allocation3 + $0x90] sm:$0xff]  ;;  %vm3781_vm0 = vmmov 0   ;;  %v3782_v17 = vmov 0.0   ;;  %s3783_s25 = smov 32  }
  0x5d   :  { %3481 = vset.pattern.permute.xlu1 %v3779_v0  ;;  %121 = vperm.xlu0 %3480, %v109_v2   ;;  %v3278_v5 = vpack.c.bf16 %v209_v4, %v208_v3  ;;  %v193_v7 = vld [vmem:[#allocation3 + $0x8] sm:$0xff]  ;;  %v211_v10 = vld [vmem:[#allocation3 + $0x98] sm:$0xff]  ;;  %v194_v11 = vld [vmem:[#allocation3 + $0x10] sm:$0xff]  ;;  %vm355_vm1 = vcmask 261120   ;;  %v3972_v61 = vand.u32 127, %v117_v60  ;;  %v3784_v0 = vmov 1.0  }
  0x5e   :  { %v3280_v9 = vpack.c.bf16 %v193_v7, %v192_v6  ;;  %v195_v12 = vld [vmem:[#allocation3 + $0x18] sm:$0xff]  ;;  %v3282_v13 = vpack.c.bf16 %v211_v10, %v210_v8  ;;  %v212_v14 = vld [vmem:[#allocation3 + $0xa0] sm:$0xff]  ;;  %v213_v15 = vld [vmem:[#allocation3 + $0xa8] sm:$0xff]  ;;  %3022 = vmatprep.mubr.msk.f32.mxu1 %vm3781_vm0, %v3782_v17  ;;  %s3785_s30 = smov 64   ;;  %vm647_vm8 = vcmask 261127  }
  0x5f   :  { %3279 = vmatprep.subr.bf16.mxu0 %v3278_v5  ;;  %v3284_v16 = vpack.c.bf16 %v195_v12, %v194_v11  ;;  %v3286_v18 = vpack.c.bf16 %v213_v15, %v212_v14  ;;  %v196_v19 = vld [vmem:[#allocation3 + $0x20] sm:$0xff]  ;;  %v197_v20 = vld [vmem:[#allocation3 + $0x28] sm:$0xff]  ;;  %v214_v21 = vld [vmem:[#allocation3 + $0xb0] sm:$0xff]  ;;  %v3975_v62 = vadd.s32 128, %v3972_v61 }
  0x60   :  { %3281 = vmatpush3.bf16.msra.mxu0 %v3280_v9  ;;  %v215_v22 = vld [vmem:[#allocation3 + $0xb8] sm:$0xff]  ;;  %v3288_v23 = vpack.c.bf16 %v197_v20, %v196_v19  ;;  %v198_v25 = vld [vmem:[#allocation3 + $0x30] sm:$0xff]  ;;  %v216_v27 = vld [vmem:[#allocation3 + $0xc0] sm:$0xff] }
  0x61   :  { %3283 = vmatprep.subr.bf16.mxu0 %v3282_v13  ;;  %v3290_v24 = vpack.c.bf16 %v215_v22, %v214_v21  ;;  %v199_v26 = vld [vmem:[#allocation3 + $0x38] sm:$0xff]  ;;  %v217_v28 = vld [vmem:[#allocation3 + $0xc8] sm:$0xff]  ;;  %v336_v29 = vld [vmem:[#allocation6] sm:$0xff] }
  0x62   :  { %v337_v30 = vld [vmem:[#allocation6 + $0x8] sm:$0xff]  ;;  %v338_v31 = vld [vmem:[#allocation6 + $0x10] sm:$0xff]  ;;  %v3292_v32 = vpack.c.bf16 %v199_v26, %v198_v25  ;;  %v339_v34 = vld [vmem:[#allocation6 + $0x18] sm:$0xff]  ;;  %v3294_v36 = vpack.c.bf16 %v217_v28, %v216_v27 }
  0x63   :  { %v3952_v33 = vpack.c.bf16 %v337_v30, %v336_v29  ;;  %v350_v35 = vld [vmem:[%s4455_s10] sm:$0xff]  ;;  %v200_v37 = vld [vmem:[#allocation3 + $0x40] sm:$0xff]  ;;  %v201_v38 = vld [vmem:[#allocation3 + $0x48] sm:$0xff]  ;;  %v3959_v41 = vpack.c.bf16 %v339_v34, %v338_v31 }
  0x64   :  { %3285 = vmatpush3.bf16.msra.mxu0 %v3284_v16  ;;  %439 = vrot.lane.b32.xlu1 %v350_v35, %s3783_s25  ;;  %v218_v39 = vld [vmem:[#allocation3 + $0xd0] sm:$0xff]  ;;  %v219_v40 = vld [vmem:[#allocation3 + $0xd8] sm:$0xff]  ;;  %v3296_v42 = vpack.c.bf16 %v201_v38, %v200_v37  ;;  %v220_v46 = vld [vmem:[#allocation3 + $0xe0] sm:$0xff] }
  0x65   :  { %3287 = vmatprep.subr.bf16.mxu0 %v3286_v18  ;;  %3312 = vmatpush3.bf16.msra.mxu1 %v3952_v33  ;;  %v3298_v43 = vpack.c.bf16 %v219_v40, %v218_v39  ;;  %v202_v44 = vld [vmem:[#allocation3 + $0x50] sm:$0xff]  ;;  %v203_v45 = vld [vmem:[#allocation3 + $0x58] sm:$0xff]  ;;  %v221_v47 = vld [vmem:[#allocation3 + $0xe8] sm:$0xff] }
  0x66   :  { %3313 = vmatprep.subr.bf16.mxu1 %v3780_v1  ;;  %v349_v48 = vld [vmem:[%s4454_s9] sm:$0xff]  ;;  %v3300_v49 = vpack.c.bf16 %v203_v45, %v202_v44  ;;  %v3302_v50 = vpack.c.bf16 %v221_v47, %v220_v46  ;;  %v204_v51 = vld [vmem:[#allocation3 + $0x60] sm:$0xff]  ;;  %v205_v52 = vld [vmem:[#allocation3 + $0x68] sm:$0xff] }
  0x67   :  { %v222_v53 = vld [vmem:[#allocation3 + $0xf0] sm:$0xff]  ;;  %v223_v54 = vld [vmem:[#allocation3 + $0xf8] sm:$0xff]  ;;  %v3304_v55 = vpack.c.bf16 %v205_v52, %v204_v51  ;;  %v345_v25 = vld [vmem:[#allocation9 + $0x8] sm:$0xff] }
  0x68   :  { %3289 = vmatpush3.bf16.msra.mxu0 %v3288_v23  ;;  %v3306_v56 = vpack.c.bf16 %v223_v54, %v222_v53  ;;  %v206_v57 = vld [vmem:[#allocation3 + $0x70] sm:$0xff]  ;;  %v207_v58 = vld [vmem:[#allocation3 + $0x78] sm:$0xff]  ;;  %v340_v30 = vld [vmem:[#allocation8] sm:$0xff] }
  0x69   :  { %3291 = vmatprep.subr.bf16.mxu0 %v3290_v24  ;;  %3315 = vmatpush3.bf16.msra.mxu1 %v3959_v41  ;;  %v3308_v59 = vpack.c.bf16 %v207_v58, %v206_v57  ;;  %v3984_v6 = vld [vmem:[%s4448_s3] ss:$0 sm:$0xff]  ;;  %v110_v19 = vld [vmem:[%s4445_s0 + $0x8] sm:$0xff]  ;;  %v344_v24 = vld [vmem:[#allocation9] sm:$0xff] }
  0x6a   :  { %3316 = vmatprep.subr.bf16.mxu1 %v3780_v1  ;;  %v346_v26 = vld [vmem:[#allocation9 + $0x10] sm:$0xff]  ;;  %v3995_v27 = vpack.c.bf16 %v345_v25, %v344_v24  ;;  %v347_v28 = vld [vmem:[#allocation9 + $0x18] sm:$0xff]  ;;  %v341_v31 = vld [vmem:[#allocation8 + $0x8] sm:$0xff] }
  0x6b   :  { %v3998_v29 = vpack.c.bf16 %v347_v28, %v346_v26  ;;  %v4007_v34 = vpack.c.bf16 %v341_v31, %v340_v30  ;;  %v342_v35 = vld [vmem:[#allocation8 + $0x10] sm:$0xff]  ;;  %v111_v30 = vld [vmem:[%s4445_s0 + $0x10] sm:$0xff] }
  0x6c   :  { %3293 = vmatpush3.bf16.msra.mxu0 %v3292_v32  ;;  %3023 = vmatmul.mubr.msk.f32.vlgmr.msra.gmra.mrb[0].mxu1 %vm355_vm1, %v349_v48  ;;  %v2778_v32 = vld [vmem:[%s4454_s9 + $0x8] sm:$0xff] }
  0x6d   :  { %3295 = vmatprep.subr.bf16.mxu0 %v3294_v36  ;;  %3033 = vmatprep.mubr.msk.f32.mxu1 %vm3781_vm0, %v3782_v17  ;;  %v343_v36 = vld [vmem:[#allocation8 + $0x18] sm:$0xff] }
  0x6e   :  { %3318 = vmatpush3.bf16.msra.mxu1 %v3995_v27  ;;  %v4015_v38 = vpack.c.bf16 %v343_v36, %v342_v35 }
  0x6f   :  { %3319 = vmatprep.subr.bf16.mxu1 %v3780_v1 }
  0x70   :  { %3297 = vmatpush3.bf16.msra.mxu0 %v3296_v42 }
  0x71   :  { %3299 = vmatprep.subr.bf16.mxu0 %v3298_v43 }
  0x72   :  { %3321 = vmatpush3.bf16.msra.mxu1 %v3998_v29 }
  0x73   :  { %3322 = vmatprep.subr.bf16.mxu1 %v3780_v1 }
  0x74   :  { %3301 = vmatpush3.bf16.msra.mxu0 %v3300_v49  ;;  %v4041_v49 = vld [vmem:[#allocation11] ss:$0 sm:$0xff] }
  0x75   :  { %3303 = vmatprep.subr.bf16.mxu0 %v3302_v50  ;;  %3034 = vmatmul.mubr.msk.f32.vlgmr.msra.gmra.mrb[2].mxu1 %vm355_vm1, %v2778_v32 }
  0x76   :  { %3324 = vmatpush3.bf16.msra.mxu1 %v4007_v34  ;;  %3044 = vmatprep.mubr.msk.f32.mxu1 %vm3781_vm0, %v3782_v17 }
  0x77   :  { %3325 = vmatprep.subr.bf16.mxu1 %v3780_v1 }
  0x78   :  { %3305 = vmatpush3.bf16.msra.mxu0 %v3304_v55 }
  0x79   :  { %3307 = vmatprep.subr.bf16.mxu0 %v3306_v56 }
  0x7a   :  { %3327 = vmatpush3.bf16.msra.mxu1 %v4015_v38 }
  0x7b   :  { %3328 = vmatprep.subr.bf16.mxu1 %v3780_v1 }
  0x7c   :  { %3309 = vmatpush3.bf16.msra.mxu0 %v3308_v59 }
  0x7d   :  { %3352 = vmatprep.subr.bf16.mxu0 %v3780_v1 }
  0xd6   :  { %v440_v20 = vpop.permute.xlu1 %439 }
  0xdc   :  { %v122_v63 = vpop.permute.xlu0 %121 }
  0xdd   :  { %vm144_vm2 = vcmp.eq.s32.totalorder %v3972_v61, %v122_v63  ;;  %vm145_vm3 = vcmp.eq.s32.totalorder %v3975_v62, %v122_v63 }
  0xde   :  { %2762 = vmatprep.mubr.msk.f32.mxu0 %vm145_vm3, %v3784_v0 }
  0xdf   :  { %2763 = vmatmul.mubr.msk.f32.vlgmr.msra.gmra.mrb[0].mxu0 %vm144_vm2, %v3784_v0 }
  0xe0   :  { %3354 = vmatpush3.bf16.msra.mxu0 %v3995_v27 }
  0xe1   :  { %3355 = vmatprep.subr.bf16.mxu0 %v3780_v1 }
  0xe4   :  { %3357 = vmatpush3.bf16.msra.mxu0 %v3998_v29 }
  0xe5   :  { %3364 = vmatprep.subr.bf16.mxu0 %v3780_v1 }
 0x13f   :  { %v425_v2 = vpop.f32.mrb[0].mxu1 }
 0x140   :  { %v3024_v3 = vpop.f32.mrb[1].mxu1 }
 0x148   :  { %v528_v43 = vpop.f32.mrb[2].mxu1 }
 0x149   :  { %v3035_v44 = vpop.f32.mrb[3].mxu1 }
 0x1b2   :  { %v2870_v4 = vpop.f32.mrb[0].mxu0 }
 0x1b3   :  { %v2871_v5 = vpop.f32.mrb[1].mxu0 }
 0x1b4   :  { %v2872_v7 = vadd.f32 %v2871_v5, %v2870_v4 }
 0x1b6   :  { %v298_v8 = vadd.f32 %v2872_v7, %v3984_v6 }
 0x1b8   :  { %v429_v9 = vadd.f32 %v425_v2, %v298_v8 }
 0x1ba   :  { %v2781_v10 = vmul.f32 -1.442695, %v429_v9 }
 0x1bc   :  { %3482 = vpow2.f32 %v2781_v10  ;;  %v2779_v10 = vld [vmem:[%s4455_s10 + $0x8] sm:$0xff] }
 0x1c6   :  { %v3483_v11 = vpop.eup %3482 }
 0x1c7   :  { %v433_v12 = vadd.f32 1.0, %v3483_v11 }
 0x1c9   :  { %3484 = vrcp.f32 %v433_v12 }
 0x1d3   :  { %v3485_v13 = vpop.eup %3484 }
 0x1d4   :  { %v436_v14 = vmul.f32 2.0, %v3485_v13  ;;  %v442_v21 = vmul.f32 %v3485_v13, %v440_v20 }
 0x1d6   :  { %v2782_v15 = vadd.f32 -1.0, %v436_v14 }
 0x1d8   :  { %444 = vrot.lane.b32.xlu0 %v2782_v15, %s3785_s30 }
 0x24a   :  { %v445_v16 = vpop.permute.xlu0 %444 }
 0x24b   :  { %v447_v18 = vmul.f32 %v3485_v13, %v445_v16 }
 0x24d   :  { %449 = vrot.lane.b32.xlu1 %v447_v18, %s3783_s25 }
 0x251   :  { %124 = vperm.xlu1 %3481, %v110_v19  }
 0x2bf   :  { %v450_v22 = vpop.permute.xlu1 %449 }
 0x2c0   :  { %v3992_v23 = vadd.f32 %v450_v22, %v442_v21 }
 0x2c2   :  { %3486 = vtanh.f32 %v3992_v23 }
 0x2cc   :  { %v3487_v37 = vpop.eup %3486 }
 0x2cd   :  { %455 = vrot.lane.b32.xlu0 %v3487_v37, %s3785_s30 }
 0x2d0   :  { %v125_v39 = vpop.permute.xlu1 %124 }
 0x2d1   :  { %vm146_vm4 = vcmp.eq.s32.totalorder %v3972_v61, %v125_v39  ;;  %vm147_vm5 = vcmp.eq.s32.totalorder %v3975_v62, %v125_v39 }
 0x2d2   :  { %2764 = vmatprep.mubr.msk.f32.mxu0 %vm147_vm5, %v3784_v0 }
 0x2d3   :  { %2765 = vmatmul.mubr.msk.f32.gmra.mrb[2].mxu0 %vm146_vm4, %v3784_v0 }
 0x33f   :  { %v456_v40 = vpop.permute.xlu0 %455 }
 0x340   :  { %v458_v42 = vmul.f32 %v3485_v13, %v456_v40 }
 0x342   :  { %533 = vrot.lane.b32.xlu0 %v458_v42, %s3783_s25 }
 0x3a6   :  { %v2873_v46 = vpop.f32.mrb[2].mxu0 }
 0x3a7   :  { %v2874_v47 = vpop.f32.mrb[3].mxu0 }
 0x3a8   :  { %v2875_v48 = vadd.f32 %v2874_v47, %v2873_v46 }
 0x3aa   :  { %v303_v55 = vadd.f32 %v2875_v48, %v3984_v6 }
 0x3b4   :  { %v534_v45 = vpop.permute.xlu0 %533 }
 0x3b5   :  { %3045 = vmatmul.mubr.msk.f32.vlgmr.msra.gmra.mrb[4].mxu1 %vm355_vm1, %v534_v45 }
 0x3b6   :  { %3330 = vmatpush3.bf16.msra.mxu1 %v3952_v33  ;;  %3055 = vmatprep.mubr.msk.f32.mxu1 %vm3781_vm0, %v3782_v17 }
 0x3b7   :  { %3331 = vmatprep.subr.bf16.mxu1 %v3780_v1 }
 0x3ba   :  { %3333 = vmatpush3.bf16.msra.mxu1 %v3959_v41 }
 0x3bb   :  { %3334 = vmatprep.subr.bf16.mxu1 %v3780_v1 }
 0x3bd   :  { %3056 = vmatmul.mubr.msk.f32.vlgmr.msra.gmra.mrb[6].mxu1 %vm355_vm1, %v534_v45 }
 0x3be   :  { %3336 = vmatpush3.bf16.msra.mxu1 %v3995_v27  ;;  %3066 = vmatprep.mubr.msk.f32.mxu1 %vm3781_vm0, %v3782_v17 }
 0x3bf   :  { %3337 = vmatprep.subr.bf16.mxu1 %v3780_v1 }
 0x3c2   :  { %3339 = vmatpush3.bf16.msra.mxu1 %v3998_v29 }
 0x3c3   :  { %3340 = vmatprep.subr.bf16.mxu1 %v3780_v1 }
 0x488   :  { %v603_v50 = vpop.f32.mrb[4].mxu1 }
 0x489   :  { %v604_v51 = vadd.f32 %v603_v50, %v528_v43  ;;  %v3046_v52 = vpop.f32.mrb[5].mxu1 }
 0x48b   :  { %v613_v53 = vadd.f32 %v4041_v49, %v604_v51 }
 0x48d   :  { %v2786_v54 = vmul.f32 -1.442695, %v613_v53 }
 0x48f   :  { %3488 = vpow2.f32 %v2786_v54 }
 0x490   :  { %v715_v56 = vpop.f32.mrb[6].mxu1 }
 0x491   :  { %v719_v57 = vadd.f32 %v715_v56, %v303_v55  ;;  %v3057_v58 = vpop.f32.mrb[7].mxu1 }
 0x493   :  { %v2789_v59 = vmul.f32 -1.442695, %v719_v57 }
 0x495   :  { %3490 = vpow2.f32 %v2789_v59 }
 0x499   :  { %v3489_v63 = vpop.eup %3488 }
 0x49a   :  { %v617_v2 = vadd.f32 1.0, %v3489_v63 }
 0x49c   :  { %3492 = vrcp.f32 %v617_v2 }
 0x49f   :  { %v3491_v3 = vpop.eup %3490 }
 0x4a0   :  { %v723_v4 = vadd.f32 1.0, %v3491_v3 }
 0x4a2   :  { %3494 = vrcp.f32 %v723_v4 }
 0x4a6   :  { %v3493_v5 = vpop.eup %3492 }
 0x4a7   :  { %v620_v7 = vmul.f32 2.0, %v3493_v5 }
 0x4a9   :  { %v2787_v8 = vadd.f32 -1.0, %v620_v7 }
 0x4ab   :  { %628 = vrot.lane.b32.xlu1 %v2787_v8, %s3785_s30 }
 0x4ac   :  { %v3495_v9 = vpop.eup %3494 }
 0x4ad   :  { %v726_v11 = vmul.f32 2.0, %v3495_v9  ;;  %v728_v22 = vmul.f32 %v3495_v9, %v3992_v23 }
 0x4af   :  { %623 = vrot.lane.b32.xlu1 %v2779_v10, %s3783_s25  ;;  %v2790_v12 = vadd.f32 -1.0, %v726_v11 }
 0x4b1   :  { %730 = vrot.lane.b32.xlu0 %v2790_v12, %s3785_s30 }
 0x51d   :  { %v629_v13 = vpop.permute.xlu1 %628 }
 0x51e   :  { %v631_v14 = vmul.f32 %v3493_v5, %v629_v13 }
 0x520   :  { %633 = vrot.lane.b32.xlu0 %v631_v14, %s3783_s25 }
 0x521   :  { %v624_v18 = vpop.permute.xlu1 %623 }
 0x522   :  { %v626_v19 = vmul.f32 %v3493_v5, %v624_v18 }
 0x523   :  { %v731_v15 = vpop.permute.xlu0 %730 }
 0x524   :  { %v733_v16 = vmul.f32 %v3495_v9, %v731_v15 }
 0x526   :  { %735 = vrot.lane.b32.xlu1 %v733_v16, %s3783_s25 }
 0x592   :  { %v634_v20 = vpop.permute.xlu0 %633 }
 0x593   :  { %v4053_v21 = vadd.f32 %v634_v20, %v626_v19 }
 0x595   :  { %3496 = vtanh.f32 %v4053_v21 }
 0x598   :  { %v736_v24 = vpop.permute.xlu1 %735 }
 0x599   :  { %v4057_v25 = vadd.f32 %v736_v24, %v728_v22  ;;  %v112_v22 = vld [vmem:[%s4445_s0 + $0x18] sm:$0xff]  ;;  %v114_v24 = vld [vmem:[%s4445_s0 + $0x28] sm:$0xff] }
 0x59b   :  { %3498 = vtanh.f32 %v4057_v25 }
 0x59f   :  { %v3497_v26 = vpop.eup %3496 }
 0x5a0   :  { %639 = vrot.lane.b32.xlu0 %v3497_v26, %s3785_s30  ;;  %v116_v26 = vld [vmem:[%s4445_s0 + $0x38] sm:$0xff] }
 0x5a5   :  { %v3499_v28 = vpop.eup %3498 }
 0x5a6   :  { %741 = vrot.lane.b32.xlu1 %v3499_v28, %s3785_s30  ;;  %v115_v28 = vld [vmem:[%s4445_s0 + $0x30] sm:$0xff] }
 0x5aa   :  { %127 = vperm.xlu1 %3481, %v111_v30  }
 0x612   :  { %v640_v31 = vpop.permute.xlu0 %639 }
 0x613   :  { %v642_v32 = vmul.f32 %v3493_v5, %v640_v31 }
 0x615   :  { %644 = vrot.lane.b32.xlu0 %v642_v32, %s3783_s25 }
 0x618   :  { %v742_v23 = vpop.permute.xlu1 %741 }
 0x619   :  { %v744_v35 = vmul.f32 %v3495_v9, %v742_v23 }
 0x61b   :  { %818 = vrot.lane.b32.xlu0 %v744_v35, %s3783_s25 }
 0x629   :  { %v128_v36 = vpop.permute.xlu1 %127 }
 0x62a   :  { %vm148_vm6 = vcmp.eq.s32.totalorder %v3972_v61, %v128_v36  ;;  %vm149_vm7 = vcmp.eq.s32.totalorder %v3975_v62, %v128_v36 }
 0x62b   :  { %2766 = vmatprep.mubr.msk.f32.mxu0 %vm149_vm7, %v3784_v0 }
 0x62c   :  { %2767 = vmatmul.mubr.msk.f32.gmra.mrb[4].mxu0 %vm148_vm6, %v3784_v0 }
 0x687   :  { %v645_v37 = vpop.permute.xlu0 %644 }
 0x688   :  { %648 = vst.msk [vmem:[#allocation2 - $0x7] sm:$0x80] %vm647_vm8, %v645_v37  ;;  %3067 = vmatmul.mubr.msk.f32.vlgmr.msra.gmra.mrb[8].mxu1 %vm355_vm1, %v645_v37 }
 0x689   :  { %3342 = vmatpush3.bf16.msra.mxu1 %v4007_v34  ;;  %3077 = vmatprep.mubr.msk.f32.mxu1 %vm3781_vm0, %v3782_v17 }
 0x68a   :  { %3343 = vmatprep.subr.bf16.mxu1 %v3780_v1 }
 0x68d   :  { %3345 = vmatpush3.bf16.msra.mxu1 %v4015_v38  ;;  %v819_v39 = vpop.permute.xlu0 %818 }
 0x68e   :  { %3346 = vmatprep.subr.bf16.mxu1 %v3780_v1 }
 0x690   :  { %3078 = vmatmul.mubr.msk.f32.vlgmr.msra.gmra.mrb[10].mxu1 %vm355_vm1, %v819_v39 }
 0x691   :  { %3348 = vmatpush3.bf16.msra.mxu1 %v3952_v33  ;;  %3088 = vmatprep.mubr.msk.f32.mxu1 %vm3781_vm0, %v3782_v17 }
 0x692   :  { %3349 = vmatprep.subr.bf16.mxu1 %v3780_v1 }
 0x695   :  { %3351 = vmatpush3.bf16.msra.mxu1 %v3959_v41 }
 0x696   :  { %3358 = vmatprep.subr.bf16.mxu1 %v3780_v1 }
 0x698   :  { %3089 = vmatmul.mubr.msk.f32.vlgmr.msra.gmra.mrb[12].mxu1 %vm355_vm1, %v819_v39 }
 0x699   :  { %3360 = vmatpush3.bf16.msra.mxu1 %v4007_v34  ;;  %3110 = vmatprep.mubr.msk.f32.mxu1 %vm3781_vm0, %v3782_v17 }
 0x69a   :  { %3361 = vmatprep.subr.bf16.mxu1 %v3780_v1 }
 0x69d   :  { %3363 = vmatpush3.bf16.msra.mxu1 %v4015_v38 }
 0x69e   :  { %3370 = vmatprep.subr.bf16.mxu1 %v3780_v1 }
 0x6ff   :  { %v2876_v40 = vpop.f32.mrb[4].mxu0 }
 0x700   :  { %v2877_v42 = vpop.f32.mrb[5].mxu0 }
 0x701   :  { %v2878_v43 = vadd.f32 %v2877_v42, %v2876_v40 }
 0x703   :  { %v308_v52 = vadd.f32 %v2878_v43, %v3984_v6 }
 0x75b   :  { %v813_v44 = vpop.f32.mrb[8].mxu1 }
 0x75c   :  { %v3068_v45 = vpop.f32.mrb[9].mxu1 }
 0x763   :  { %v888_v46 = vpop.f32.mrb[10].mxu1 }
 0x764   :  { %v889_v47 = vadd.f32 %v888_v46, %v813_v44  ;;  %v3079_v48 = vpop.f32.mrb[11].mxu1 }
 0x766   :  { %v892_v50 = vadd.f32 %v4041_v49, %v889_v47 }
 0x768   :  { %v2793_v51 = vmul.f32 -1.442695, %v892_v50 }
 0x76a   :  { %3500 = vpow2.f32 %v2793_v51 }
 0x76b   :  { %v989_v53 = vpop.f32.mrb[12].mxu1 }
 0x76c   :  { %v993_v54 = vadd.f32 %v989_v53, %v308_v52  ;;  %v3090_v55 = vpop.f32.mrb[13].mxu1 }
 0x76e   :  { %v2796_v56 = vmul.f32 -1.442695, %v993_v54 }
 0x770   :  { %3502 = vpow2.f32 %v2796_v56 }
 0x774   :  { %v3501_v57 = vpop.eup %3500 }
 0x775   :  { %v896_v58 = vadd.f32 1.0, %v3501_v57 }
 0x777   :  { %3504 = vrcp.f32 %v896_v58 }
 0x77a   :  { %v3503_v59 = vpop.eup %3502 }
 0x77b   :  { %v997_v63 = vadd.f32 1.0, %v3503_v59 }
 0x77d   :  { %3506 = vrcp.f32 %v997_v63 }
 0x781   :  { %v3505_v2 = vpop.eup %3504 }
 0x782   :  { %v899_v3 = vmul.f32 2.0, %v3505_v2  ;;  %v901_v13 = vmul.f32 %v3505_v2, %v4053_v21 }
 0x784   :  { %v2794_v4 = vadd.f32 -1.0, %v899_v3 }
 0x786   :  { %903 = vrot.lane.b32.xlu1 %v2794_v4, %s3785_s30 }
 0x787   :  { %v3507_v5 = vpop.eup %3506 }
 0x788   :  { %v1000_v7 = vmul.f32 2.0, %v3507_v5  ;;  %v1002_v16 = vmul.f32 %v3507_v5, %v4057_v25  ;;  %v113_v25 = vld [vmem:[%s4445_s0 + $0x20] sm:$0xff] }
 0x78a   :  { %v2797_v8 = vadd.f32 -1.0, %v1000_v7 }
 0x78c   :  { %1004 = vrot.lane.b32.xlu0 %v2797_v8, %s3785_s30 }
 0x7f8   :  { %v904_v9 = vpop.permute.xlu1 %903 }
 0x7f9   :  { %v906_v10 = vmul.f32 %v3505_v2, %v904_v9 }
 0x7fb   :  { %908 = vrot.lane.b32.xlu1 %v906_v10, %s3783_s25 }
 0x7fe   :  { %v1005_v11 = vpop.permute.xlu0 %1004 }
 0x7ff   :  { %v1007_v12 = vmul.f32 %v3507_v5, %v1005_v11 }
 0x801   :  { %1009 = vrot.lane.b32.xlu0 %v1007_v12, %s3783_s25 }
 0x86d   :  { %v909_v14 = vpop.permute.xlu1 %908 }
 0x86e   :  { %v4100_v15 = vadd.f32 %v909_v14, %v901_v13 }
 0x870   :  { %3508 = vtanh.f32 %v4100_v15 }
 0x873   :  { %v1010_v18 = vpop.permute.xlu0 %1009 }
 0x874   :  { %v4104_v19 = vadd.f32 %v1010_v18, %v1002_v16 }
 0x876   :  { %3510 = vtanh.f32 %v4104_v19 }
 0x87a   :  { %v3509_v20 = vpop.eup %3508 }
 0x87b   :  { %914 = vrot.lane.b32.xlu1 %v3509_v20, %s3785_s30 }
 0x87f   :  { %130 = vperm.xlu1 %3481, %v112_v22  }
 0x880   :  { %v3511_v21 = vpop.eup %3510 }
 0x881   :  { %1015 = vrot.lane.b32.xlu0 %v3511_v21, %s3785_s30 }
 0x883   :  { %136 = vperm.xlu1 %3481, %v114_v24  }
 0x885   :  { %133 = vperm.xlu0 %3480, %v113_v25  }
 0x887   :  { %142 = vperm.xlu1 %3481, %v116_v26  }
 0x889   :  { %139 = vperm.xlu0 %3480, %v115_v28  }
 0x8ed   :  { %v915_v30 = vpop.permute.xlu1 %914 }
 0x8ee   :  { %v917_v31 = vmul.f32 %v3505_v2, %v915_v30 }
 0x8f0   :  { %919 = vrot.lane.b32.xlu0 %v917_v31, %s3783_s25 }
 0x8f3   :  { %v1016_v32 = vpop.permute.xlu0 %1015 }
 0x8f4   :  { %v1018_v23 = vmul.f32 %v3507_v5, %v1016_v32 }
 0x8f6   :  { %1092 = vrot.lane.b32.xlu1 %v1018_v23, %s3783_s25 }
 0x8fe   :  { %v131_v35 = vpop.permute.xlu1 %130 }
 0x8ff   :  { %vm150_vm9 = vcmp.eq.s32.totalorder %v3972_v61, %v131_v35  ;;  %vm151_vm10 = vcmp.eq.s32.totalorder %v3975_v62, %v131_v35 }
 0x900   :  { %2768 = vmatprep.mubr.msk.f32.mxu0 %vm151_vm10, %v3784_v0 }
 0x901   :  { %2769 = vmatmul.mubr.msk.f32.gmra.mrb[6].mxu0 %vm150_vm9, %v3784_v0 }
 0x902   :  { %v137_v36 = vpop.permute.xlu1 %136 }
 0x903   :  { %vm155_vm13 = vcmp.eq.s32.totalorder %v3975_v62, %v137_v36  ;;  %vm154_vm14 = vcmp.eq.s32.totalorder %v3972_v61, %v137_v36 }
 0x904   :  { %v134_v37 = vpop.permute.xlu0 %133 }
 0x905   :  { %vm152_vm11 = vcmp.eq.s32.totalorder %v3972_v61, %v134_v37  ;;  %vm153_vm12 = vcmp.eq.s32.totalorder %v3975_v62, %v134_v37 }
 0x906   :  { %2770 = vmatprep.mubr.msk.f32.mxu0 %vm153_vm12, %v3784_v0  ;;  %v143_v40 = vpop.permute.xlu1 %142 }
 0x907   :  { %2771 = vmatmul.mubr.msk.f32.gmra.mrb[8].mxu0 %vm152_vm11, %v3784_v0  ;;  %vm159_vm3 = vcmp.eq.s32.totalorder %v3975_v62, %v143_v40  ;;  %vm158_vm4 = vcmp.eq.s32.totalorder %v3972_v61, %v143_v40 }
 0x908   :  { %v140_v39 = vpop.permute.xlu0 %139  ;;  %2772 = vmatprep.mubr.msk.f32.mxu0 %vm155_vm13, %v3784_v0 }
 0x909   :  { %vm157_vm15 = vcmp.eq.s32.totalorder %v3975_v62, %v140_v39  ;;  %vm156_vm2 = vcmp.eq.s32.totalorder %v3972_v61, %v140_v39 }
 0x90b   :  { %2773 = vmatmul.mubr.msk.f32.gmra.mrb[10].mxu0 %vm154_vm14, %v3784_v0 }
 0x90c   :  { %2774 = vmatprep.mubr.msk.f32.mxu0 %vm157_vm15, %v3784_v0 }
 0x90f   :  { %2775 = vmatmul.mubr.msk.f32.gmra.mrb[12].mxu0 %vm156_vm2, %v3784_v0 }
 0x910   :  { %2776 = vmatprep.mubr.msk.f32.mxu0 %vm159_vm3, %v3784_v0 }
 0x913   :  { %2777 = vmatmul.mubr.msk.f32.gmra.mrb[14].mxu0 %vm158_vm4, %v3784_v0 }
 0x914   :  { %3099 = vmatprep.mubr.msk.f32.mxu0 %vm3781_vm0, %v3782_v17 }
 0x962   :  { %v920_v42 = vpop.permute.xlu0 %919 }
 0x963   :  { %922 = vst.msk [vmem:[#allocation2 - $0x6] sm:$0x80] %vm647_vm8, %v920_v42  ;;  %3100 = vmatmul.mubr.msk.f32.vlgmr.msra.gmra.mrb[16].mxu0 %vm355_vm1, %v920_v42 }
 0x964   :  { %3366 = vmatpush3.bf16.msra.mxu0 %v3952_v33  ;;  %3121 = vmatprep.mubr.msk.f32.mxu0 %vm3781_vm0, %v3782_v17 }
 0x965   :  { %3367 = vmatprep.subr.bf16.mxu0 %v3780_v1 }
 0x968   :  { %3369 = vmatpush3.bf16.msra.mxu0 %v3959_v41  ;;  %v1093_v61 = vpop.permute.xlu1 %1092 }
 0x969   :  { %3111 = vmatmul.mubr.msk.f32.vlgmr.msra.gmra.mrb[14].mxu1 %vm355_vm1, %v1093_v61  ;;  %3376 = vmatprep.subr.bf16.mxu0 %v3780_v1 }
 0x96a   :  { %3372 = vmatpush3.bf16.msra.mxu1 %v3995_v27  ;;  %3132 = vmatprep.mubr.msk.f32.mxu1 %vm3781_vm0, %v3782_v17 }
 0x96b   :  { %3122 = vmatmul.mubr.msk.f32.vlgmr.msra.gmra.mrb[18].mxu0 %vm355_vm1, %v1093_v61  ;;  %3373 = vmatprep.subr.bf16.mxu1 %v3780_v1 }
 0x96c   :  { %3378 = vmatpush3.bf16.msra.mxu0 %v4007_v34  ;;  %3143 = vmatprep.mubr.msk.f32.mxu0 %vm3781_vm0, %v3782_v17 }
 0x96d   :  { %3379 = vmatprep.subr.bf16.mxu0 %v3780_v1 }
 0x96e   :  { %3375 = vmatpush3.bf16.msra.mxu1 %v3998_v29 }
 0x96f   :  { %3382 = vmatprep.subr.bf16.mxu1 %v3780_v1 }
 0x970   :  { %3381 = vmatpush3.bf16.msra.mxu0 %v4015_v38 }
 0x971   :  { %3388 = vmatprep.subr.bf16.mxu0 %v3780_v1 }
 0x9d4   :  { %v2879_v62 = vpop.f32.mrb[6].mxu0 }
 0x9d5   :  { %v2880_v0 = vpop.f32.mrb[7].mxu0 }
 0x9d6   :  { %v2881_v43 = vadd.f32 %v2880_v0, %v2879_v62 }
 0x9d8   :  { %v313_v3 = vadd.f32 %v2881_v43, %v3984_v6 }
 0x9da   :  { %v2882_v44 = vpop.f32.mrb[8].mxu0 }
 0x9db   :  { %v2883_v45 = vpop.f32.mrb[9].mxu0 }
 0x9dc   :  { %v4170_v46 = vadd.f32 %v2883_v45, %v2882_v44 }
 0x9de   :  { %v2885_v47 = vpop.f32.mrb[10].mxu0 }
 0x9df   :  { %v2886_v48 = vpop.f32.mrb[11].mxu0 }
 0x9e0   :  { %v4172_v50 = vadd.f32 %v2886_v48, %v2885_v47 }
 0x9e2   :  { %v2888_v51 = vpop.f32.mrb[12].mxu0 }
 0x9e3   :  { %v2889_v52 = vpop.f32.mrb[13].mxu0 }
 0x9e4   :  { %v4174_v53 = vadd.f32 %v2889_v52, %v2888_v51 }
 0x9e6   :  { %v2891_v54 = vpop.f32.mrb[14].mxu0 }
 0x9e7   :  { %v2892_v55 = vpop.f32.mrb[15].mxu0 }
 0x9e8   :  { %v4176_v56 = vadd.f32 %v2892_v55, %v2891_v54  ;;  %v318_v54 = vadd.f32 %v4170_v46, %v3984_v6 }
 0xa36   :  { %v1087_v57 = vpop.f32.mrb[16].mxu0 }
 0xa37   :  { %v3101_v58 = vpop.f32.mrb[17].mxu0 }
 0xa3c   :  { %v1162_v59 = vpop.f32.mrb[14].mxu1 }
 0xa3d   :  { %v1163_v63 = vadd.f32 %v1162_v59, %v1087_v57  ;;  %v3112_v2 = vpop.f32.mrb[15].mxu1 }
 0xa3e   :  { %v1263_v4 = vpop.f32.mrb[18].mxu0 }
 0xa3f   :  { %v1166_v5 = vadd.f32 %v4041_v49, %v1163_v63  ;;  %v1267_v7 = vadd.f32 %v1263_v4, %v313_v3  ;;  %v3123_v8 = vpop.f32.mrb[19].mxu0 }
 0xa41   :  { %v2800_v9 = vmul.f32 -1.442695, %v1166_v5  ;;  %v2803_v10 = vmul.f32 -1.442695, %v1267_v7 }
 0xa43   :  { %3512 = vpow2.f32 %v2800_v9 }
 0xa44   :  { %3514 = vpow2.f32 %v2803_v10 }
 0xa4d   :  { %v3513_v11 = vpop.eup %3512 }
 0xa4e   :  { %v3515_v12 = vpop.eup %3514  ;;  %v1170_v13 = vadd.f32 1.0, %v3513_v11 }
 0xa4f   :  { %v1271_v14 = vadd.f32 1.0, %v3515_v12 }
 0xa50   :  { %3516 = vrcp.f32 %v1170_v13 }
 0xa51   :  { %3518 = vrcp.f32 %v1271_v14 }
 0xa5a   :  { %v3517_v16 = vpop.eup %3516 }
 0xa5b   :  { %v3519_v18 = vpop.eup %3518  ;;  %v1173_v20 = vmul.f32 2.0, %v3517_v16  ;;  %v1175_v31 = vmul.f32 %v3517_v16, %v4100_v15 }
 0xa5c   :  { %v1274_v22 = vmul.f32 2.0, %v3519_v18  ;;  %v1276_v32 = vmul.f32 %v3519_v18, %v4104_v19 }
 0xa5d   :  { %v2801_v21 = vadd.f32 -1.0, %v1173_v20 }
 0xa5e   :  { %v2804_v24 = vadd.f32 -1.0, %v1274_v22 }
 0xa5f   :  { %1177 = vrot.lane.b32.xlu0 %v2801_v21, %s3785_s30 }
 0xa60   :  { %1278 = vrot.lane.b32.xlu1 %v2804_v24, %s3785_s30 }
 0xad1   :  { %v1178_v25 = vpop.permute.xlu0 %1177 }
 0xad2   :  { %v1279_v26 = vpop.permute.xlu1 %1278  ;;  %v1180_v28 = vmul.f32 %v3517_v16, %v1178_v25 }
 0xad3   :  { %v1281_v30 = vmul.f32 %v3519_v18, %v1279_v26 }
 0xad4   :  { %1182 = vrot.lane.b32.xlu0 %v1180_v28, %s3783_s25 }
 0xad5   :  { %1283 = vrot.lane.b32.xlu1 %v1281_v30, %s3783_s25 }
 0xb46   :  { %v1183_v23 = vpop.permute.xlu0 %1182 }
 0xb47   :  { %v1284_v35 = vpop.permute.xlu1 %1283  ;;  %v4186_v36 = vadd.f32 %v1183_v23, %v1175_v31 }
 0xb48   :  { %v4188_v37 = vadd.f32 %v1284_v35, %v1276_v32 }
 0xb49   :  { %3520 = vtanh.f32 %v4186_v36 }
 0xb4a   :  { %3522 = vtanh.f32 %v4188_v37 }
 0xb53   :  { %v3521_v39 = vpop.eup %3520 }
 0xb54   :  { %v3523_v40 = vpop.eup %3522  ;;  %1188 = vrot.lane.b32.xlu0 %v3521_v39, %s3785_s30 }
 0xb55   :  { %1289 = vrot.lane.b32.xlu1 %v3523_v40, %s3785_s30 }
 0xbc6   :  { %v1189_v42 = vpop.permute.xlu0 %1188 }
 0xbc7   :  { %v1290_v15 = vpop.permute.xlu1 %1289  ;;  %v1191_v61 = vmul.f32 %v3517_v16, %v1189_v42 }
 0xbc8   :  { %v1292_v19 = vmul.f32 %v3519_v18, %v1290_v15  ;;  %v323_v15 = vadd.f32 %v4172_v50, %v3984_v6 }
 0xbc9   :  { %1193 = vrot.lane.b32.xlu0 %v1191_v61, %s3783_s25 }
 0xbca   :  { %1366 = vrot.lane.b32.xlu1 %v1292_v19, %s3783_s25 }
 0xc3b   :  { %v1194_v62 = vpop.permute.xlu0 %1193 }
 0xc3c   :  { %v1367_v0 = vpop.permute.xlu1 %1366  ;;  %1196 = vst.msk [vmem:[#allocation2 - $0x5] sm:$0x80] %vm647_vm8, %v1194_v62  ;;  %3133 = vmatmul.mubr.msk.f32.vlgmr.msra.gmra.mrb[16].mxu1 %vm355_vm1, %v1194_v62 }
 0xc3d   :  { %3144 = vmatmul.mubr.msk.f32.vlgmr.msra.gmra.mrb[20].mxu0 %vm355_vm1, %v1367_v0  ;;  %3384 = vmatpush3.bf16.msra.mxu1 %v3952_v33 }
 0xc3e   :  { %3385 = vmatprep.subr.bf16.mxu1 %v3780_v1  ;;  %3154 = vmatprep.mubr.msk.f32.mxu1 %vm3781_vm0, %v3782_v17 }
 0xc3f   :  { %3390 = vmatpush3.bf16.msra.mxu0 %v3995_v27  ;;  %3165 = vmatprep.mubr.msk.f32.mxu0 %vm3781_vm0, %v3782_v17 }
 0xc40   :  { %3391 = vmatprep.subr.bf16.mxu0 %v3780_v1 }
 0xc41   :  { %3387 = vmatpush3.bf16.msra.mxu1 %v3959_v41 }
 0xc42   :  { %3394 = vmatprep.subr.bf16.mxu1 %v3780_v1 }
 0xc43   :  { %3393 = vmatpush3.bf16.msra.mxu0 %v3998_v29 }
 0xc44   :  { %3155 = vmatmul.mubr.msk.f32.vlgmr.msra.gmra.mrb[18].mxu1 %vm355_vm1, %v1367_v0  ;;  %3400 = vmatprep.subr.bf16.mxu0 %v3780_v1 }
 0xc45   :  { %3396 = vmatpush3.bf16.msra.mxu1 %v4007_v34  ;;  %3176 = vmatprep.mubr.msk.f32.mxu1 %vm3781_vm0, %v3782_v17 }
 0xc46   :  { %3397 = vmatprep.subr.bf16.mxu1 %v3780_v1 }
 0xc49   :  { %3399 = vmatpush3.bf16.msra.mxu1 %v4015_v38 }
 0xc4a   :  { %3406 = vmatprep.subr.bf16.mxu1 %v3780_v1 }
 0xd0f   :  { %v1361_v43 = vpop.f32.mrb[16].mxu1 }
 0xd10   :  { %v1436_v44 = vpop.f32.mrb[20].mxu0  ;;  %v3134_v45 = vpop.f32.mrb[17].mxu1 }
 0xd11   :  { %v1437_v47 = vadd.f32 %v1436_v44, %v1361_v43  ;;  %v3145_v48 = vpop.f32.mrb[21].mxu0 }
 0xd13   :  { %v1440_v51 = vadd.f32 %v4041_v49, %v1437_v47 }
 0xd15   :  { %v2807_v52 = vmul.f32 -1.442695, %v1440_v51 }
 0xd17   :  { %3524 = vpow2.f32 %v2807_v52  ;;  %v1537_v55 = vpop.f32.mrb[18].mxu1 }
 0xd18   :  { %v1541_v57 = vadd.f32 %v1537_v55, %v318_v54  ;;  %v3156_v58 = vpop.f32.mrb[19].mxu1 }
 0xd1a   :  { %v2810_v59 = vmul.f32 -1.442695, %v1541_v57 }
 0xd1c   :  { %3526 = vpow2.f32 %v2810_v59 }
 0xd21   :  { %v3525_v63 = vpop.eup %3524 }
 0xd22   :  { %v1444_v2 = vadd.f32 1.0, %v3525_v63 }
 0xd24   :  { %3528 = vrcp.f32 %v1444_v2 }
 0xd26   :  { %v3527_v3 = vpop.eup %3526 }
 0xd27   :  { %v1545_v4 = vadd.f32 1.0, %v3527_v3 }
 0xd29   :  { %3530 = vrcp.f32 %v1545_v4 }
 0xd2e   :  { %v3529_v5 = vpop.eup %3528 }
 0xd2f   :  { %v1447_v7 = vmul.f32 2.0, %v3529_v5  ;;  %v1449_v16 = vmul.f32 %v3529_v5, %v4186_v36 }
 0xd31   :  { %v2808_v8 = vadd.f32 -1.0, %v1447_v7 }
 0xd33   :  { %v3531_v9 = vpop.eup %3530  ;;  %1451 = vrot.lane.b32.xlu0 %v2808_v8, %s3785_s30 }
 0xd34   :  { %v1548_v10 = vmul.f32 2.0, %v3531_v9  ;;  %v1550_v22 = vmul.f32 %v3531_v9, %v4188_v37 }
 0xd36   :  { %v2811_v46 = vadd.f32 -1.0, %v1548_v10 }
 0xd38   :  { %1552 = vrot.lane.b32.xlu1 %v2811_v46, %s3785_s30 }
 0xda5   :  { %v1452_v11 = vpop.permute.xlu0 %1451 }
 0xda6   :  { %v1454_v12 = vmul.f32 %v3529_v5, %v1452_v11 }
 0xda8   :  { %1456 = vrot.lane.b32.xlu0 %v1454_v12, %s3783_s25 }
 0xdaa   :  { %v1553_v13 = vpop.permute.xlu1 %1552 }
 0xdab   :  { %v1555_v14 = vmul.f32 %v3531_v9, %v1553_v13 }
 0xdad   :  { %1557 = vrot.lane.b32.xlu1 %v1555_v14, %s3783_s25 }
 0xe1a   :  { %v1457_v18 = vpop.permute.xlu0 %1456 }
 0xe1b   :  { %v4226_v20 = vadd.f32 %v1457_v18, %v1449_v16 }
 0xe1d   :  { %3532 = vtanh.f32 %v4226_v20 }
 0xe1f   :  { %v1558_v21 = vpop.permute.xlu1 %1557 }
 0xe20   :  { %v4230_v24 = vadd.f32 %v1558_v21, %v1550_v22 }
 0xe22   :  { %3534 = vtanh.f32 %v4230_v24 }
 0xe27   :  { %v3533_v25 = vpop.eup %3532 }
 0xe28   :  { %1462 = vrot.lane.b32.xlu0 %v3533_v25, %s3785_s30 }
 0xe2c   :  { %v3535_v26 = vpop.eup %3534 }
 0xe2d   :  { %1563 = vrot.lane.b32.xlu1 %v3535_v26, %s3785_s30 }
 0xe9a   :  { %v1463_v28 = vpop.permute.xlu0 %1462 }
 0xe9b   :  { %v1465_v30 = vmul.f32 %v3529_v5, %v1463_v28 }
 0xe9d   :  { %1467 = vrot.lane.b32.xlu0 %v1465_v30, %s3783_s25  ;;  %v4304_v30 = vld [vmem:[%s4448_s3] ss:$0 sm:$0xff] }
 0xe9f   :  { %v1564_v31 = vpop.permute.xlu1 %1563 }
 0xea0   :  { %v1566_v32 = vmul.f32 %v3531_v9, %v1564_v31  ;;  %v328_v31 = vadd.f32 %v4304_v30, %v4174_v53 }
 0xea2   :  { %1640 = vrot.lane.b32.xlu1 %v1566_v32, %s3783_s25 }
 0xf0f   :  { %v1468_v23 = vpop.permute.xlu0 %1467 }
 0xf10   :  { %1470 = vst.msk [vmem:[#allocation2 - $0x4] sm:$0x80] %vm647_vm8, %v1468_v23  ;;  %3166 = vmatmul.mubr.msk.f32.vlgmr.msra.gmra.mrb[22].mxu0 %vm355_vm1, %v1468_v23 }
 0xf11   :  { %3402 = vmatpush3.bf16.msra.mxu0 %v3952_v33  ;;  %3187 = vmatprep.mubr.msk.f32.mxu0 %vm3781_vm0, %v3782_v17 }
 0xf12   :  { %3403 = vmatprep.subr.bf16.mxu0 %v3780_v1 }
 0xf14   :  { %v1641_v35 = vpop.permute.xlu1 %1640 }
 0xf15   :  { %3405 = vmatpush3.bf16.msra.mxu0 %v3959_v41  ;;  %3177 = vmatmul.mubr.msk.f32.vlgmr.msra.gmra.mrb[20].mxu1 %vm355_vm1, %v1641_v35 }
 0xf16   :  { %3408 = vmatpush3.bf16.msra.mxu1 %v3995_v27  ;;  %3412 = vmatprep.subr.bf16.mxu0 %v3780_v1 }
 0xf17   :  { %3409 = vmatprep.subr.bf16.mxu1 %v3780_v1  ;;  %3198 = vmatprep.mubr.msk.f32.mxu1 %vm3781_vm0, %v3782_v17 }
 0xf18   :  { %3188 = vmatmul.mubr.msk.f32.vlgmr.msra.gmra.mrb[24].mxu0 %vm355_vm1, %v1641_v35 }
 0xf19   :  { %3414 = vmatpush3.bf16.msra.mxu0 %v4007_v34  ;;  %3209 = vmatprep.mubr.msk.f32.mxu0 %vm3781_vm0, %v3782_v17 }
 0xf1a   :  { %3411 = vmatpush3.bf16.msra.mxu1 %v3998_v29  ;;  %3415 = vmatprep.subr.bf16.mxu0 %v3780_v1 }
 0xf1b   :  { %3418 = vmatprep.subr.bf16.mxu1 %v3780_v1 }
 0xf1d   :  { %3417 = vmatpush3.bf16.msra.mxu0 %v4015_v38 }
 0xf1e   :  { %3424 = vmatprep.subr.bf16.mxu0 %v3780_v1 }
 0xfe3   :  { %v1635_v36 = vpop.f32.mrb[22].mxu0 }
 0xfe4   :  { %v3167_v37 = vpop.f32.mrb[23].mxu0 }
 0xfe8   :  { %v1710_v39 = vpop.f32.mrb[20].mxu1 }
 0xfe9   :  { %v1711_v40 = vadd.f32 %v1710_v39, %v1635_v36  ;;  %v3178_v42 = vpop.f32.mrb[21].mxu1 }
 0xfeb   :  { %v1714_v61 = vadd.f32 %v4041_v49, %v1711_v40  ;;  %v1811_v19 = vpop.f32.mrb[24].mxu0 }
 0xfec   :  { %v1815_v62 = vadd.f32 %v1811_v19, %v323_v15  ;;  %v3189_v0 = vpop.f32.mrb[25].mxu0 }
 0xfed   :  { %v2814_v43 = vmul.f32 -1.442695, %v1714_v61 }
 0xfee   :  { %v2817_v44 = vmul.f32 -1.442695, %v1815_v62 }
 0xfef   :  { %3536 = vpow2.f32 %v2814_v43 }
 0xff0   :  { %3538 = vpow2.f32 %v2817_v44 }
 0xff9   :  { %v3537_v45 = vpop.eup %3536 }
 0xffa   :  { %v3539_v47 = vpop.eup %3538  ;;  %v1718_v48 = vadd.f32 1.0, %v3537_v45 }
 0xffb   :  { %v1819_v51 = vadd.f32 1.0, %v3539_v47 }
 0xffc   :  { %3540 = vrcp.f32 %v1718_v48 }
 0xffd   :  { %3542 = vrcp.f32 %v1819_v51 }
0x1006   :  { %v3541_v52 = vpop.eup %3540 }
0x1007   :  { %v3543_v54 = vpop.eup %3542  ;;  %v1721_v55 = vmul.f32 2.0, %v3541_v52  ;;  %v1723_v3 = vmul.f32 %v3541_v52, %v4226_v20 }
0x1008   :  { %v1822_v57 = vmul.f32 2.0, %v3543_v54  ;;  %v1824_v4 = vmul.f32 %v3543_v54, %v4230_v24 }
0x1009   :  { %v2815_v6 = vadd.f32 -1.0, %v1721_v55 }
0x100a   :  { %v2818_v50 = vadd.f32 -1.0, %v1822_v57 }
0x100b   :  { %1725 = vrot.lane.b32.xlu0 %v2815_v6, %s3785_s30 }
0x100c   :  { %1826 = vrot.lane.b32.xlu1 %v2818_v50, %s3785_s30 }
0x107d   :  { %v1726_v58 = vpop.permute.xlu0 %1725 }
0x107e   :  { %v1827_v59 = vpop.permute.xlu1 %1826  ;;  %v1728_v63 = vmul.f32 %v3541_v52, %v1726_v58 }
0x107f   :  { %v1829_v2 = vmul.f32 %v3543_v54, %v1827_v59 }
0x1080   :  { %1730 = vrot.lane.b32.xlu0 %v1728_v63, %s3783_s25 }
0x1081   :  { %1831 = vrot.lane.b32.xlu1 %v1829_v2, %s3783_s25 }
0x10f2   :  { %v1731_v5 = vpop.permute.xlu0 %1730 }
0x10f3   :  { %v1832_v7 = vpop.permute.xlu1 %1831  ;;  %v4268_v8 = vadd.f32 %v1731_v5, %v1723_v3 }
0x10f4   :  { %v4270_v9 = vadd.f32 %v1832_v7, %v1824_v4 }
0x10f5   :  { %3544 = vtanh.f32 %v4268_v8 }
0x10f6   :  { %3546 = vtanh.f32 %v4270_v9 }
0x10ff   :  { %v3545_v10 = vpop.eup %3544 }
0x1100   :  { %v3547_v46 = vpop.eup %3546  ;;  %1736 = vrot.lane.b32.xlu0 %v3545_v10, %s3785_s30 }
0x1101   :  { %1837 = vrot.lane.b32.xlu1 %v3547_v46, %s3785_s30 }
0x1172   :  { %v1737_v11 = vpop.permute.xlu0 %1736 }
0x1173   :  { %v1838_v12 = vpop.permute.xlu1 %1837  ;;  %v1739_v13 = vmul.f32 %v3541_v52, %v1737_v11 }
0x1174   :  { %v1840_v14 = vmul.f32 %v3543_v54, %v1838_v12 }
0x1175   :  { %1741 = vrot.lane.b32.xlu0 %v1739_v13, %s3783_s25 }
0x1176   :  { %1914 = vrot.lane.b32.xlu1 %v1840_v14, %s3783_s25 }
0x11e7   :  { %v1742_v16 = vpop.permute.xlu0 %1741 }
0x11e8   :  { %v1915_v18 = vpop.permute.xlu1 %1914  ;;  %1744 = vst.msk [vmem:[#allocation2 - $0x3] sm:$0x80] %vm647_vm8, %v1742_v16  ;;  %3199 = vmatmul.mubr.msk.f32.vlgmr.msra.gmra.mrb[22].mxu1 %vm355_vm1, %v1742_v16 }
0x11e9   :  { %3210 = vmatmul.mubr.msk.f32.vlgmr.msra.gmra.mrb[26].mxu0 %vm355_vm1, %v1915_v18  ;;  %3420 = vmatpush3.bf16.msra.mxu1 %v3952_v33 }
0x11ea   :  { %3421 = vmatprep.subr.bf16.mxu1 %v3780_v1  ;;  %3220 = vmatprep.mubr.msk.f32.mxu1 %vm3781_vm0, %v3782_v17 }
0x11eb   :  { %3426 = vmatpush3.bf16.msra.mxu0 %v3995_v27  ;;  %3231 = vmatprep.mubr.msk.f32.mxu0 %vm3781_vm0, %v3782_v17 }
0x11ec   :  { %3427 = vmatprep.subr.bf16.mxu0 %v3780_v1 }
0x11ed   :  { %3423 = vmatpush3.bf16.msra.mxu1 %v3959_v41 }
0x11ee   :  { %3430 = vmatprep.subr.bf16.mxu1 %v3780_v1 }
0x11ef   :  { %3429 = vmatpush3.bf16.msra.mxu0 %v3998_v29 }
0x11f0   :  { %3221 = vmatmul.mubr.msk.f32.vlgmr.msra.gmra.mrb[24].mxu1 %vm355_vm1, %v1915_v18  ;;  %3436 = vmatprep.subr.bf16.mxu0 %v3780_v1 }
0x11f1   :  { %3432 = vmatpush3.bf16.msra.mxu1 %v4007_v34  ;;  %3242 = vmatprep.mubr.msk.f32.mxu1 %vm3781_vm0, %v3782_v17 }
0x11f2   :  { %3433 = vmatprep.subr.bf16.mxu1 %v3780_v1 }
0x11f5   :  { %3435 = vmatpush3.bf16.msra.mxu1 %v4015_v38 }
0x11f6   :  { %3442 = vmatprep.subr.bf16.mxu1 %v3780_v1 }
0x12bb   :  { %v1909_v20 = vpop.f32.mrb[22].mxu1 }
0x12bc   :  { %v1984_v22 = vpop.f32.mrb[26].mxu0  ;;  %v3200_v21 = vpop.f32.mrb[23].mxu1 }
0x12bd   :  { %v1985_v24 = vadd.f32 %v1984_v22, %v1909_v20  ;;  %v3211_v25 = vpop.f32.mrb[27].mxu0 }
0x12bf   :  { %v1988_v26 = vadd.f32 %v4041_v49, %v1985_v24 }
0x12c1   :  { %v2821_v28 = vmul.f32 -1.442695, %v1988_v26 }
0x12c3   :  { %3548 = vpow2.f32 %v2821_v28  ;;  %v2085_v32 = vpop.f32.mrb[24].mxu1 }
0x12c4   :  { %v2089_v23 = vadd.f32 %v2085_v32, %v328_v31  ;;  %v3222_v35 = vpop.f32.mrb[25].mxu1 }
0x12c6   :  { %v2824_v36 = vmul.f32 -1.442695, %v2089_v23 }
0x12c8   :  { %3550 = vpow2.f32 %v2824_v36 }
0x12cd   :  { %v3549_v37 = vpop.eup %3548 }
0x12ce   :  { %v1992_v39 = vadd.f32 1.0, %v3549_v37 }
0x12d0   :  { %3552 = vrcp.f32 %v1992_v39 }
0x12d2   :  { %v3551_v40 = vpop.eup %3550 }
0x12d3   :  { %v2093_v42 = vadd.f32 1.0, %v3551_v40 }
0x12d5   :  { %3554 = vrcp.f32 %v2093_v42 }
0x12da   :  { %v3553_v15 = vpop.eup %3552 }
0x12db   :  { %v1995_v61 = vmul.f32 2.0, %v3553_v15  ;;  %v1997_v48 = vmul.f32 %v3553_v15, %v4268_v8  ;;  %v333_v8 = vadd.f32 %v4304_v30, %v4176_v56 }
0x12dd   :  { %v2822_v19 = vadd.f32 -1.0, %v1995_v61 }
0x12df   :  { %v3555_v62 = vpop.eup %3554  ;;  %1999 = vrot.lane.b32.xlu0 %v2822_v19, %s3785_s30 }
0x12e0   :  { %v2096_v0 = vmul.f32 2.0, %v3555_v62  ;;  %v2098_v54 = vmul.f32 %v3555_v62, %v4270_v9 }
0x12e2   :  { %v2825_v53 = vadd.f32 -1.0, %v2096_v0 }
0x12e4   :  { %2100 = vrot.lane.b32.xlu1 %v2825_v53, %s3785_s30 }
0x1351   :  { %v2000_v43 = vpop.permute.xlu0 %1999 }
0x1352   :  { %v2002_v44 = vmul.f32 %v3553_v15, %v2000_v43 }
0x1354   :  { %2004 = vrot.lane.b32.xlu0 %v2002_v44, %s3783_s25  ;;  %v3585_v44 = vld [vmem:[#allocation11] ss:$0 sm:$0xff] }
0x1356   :  { %v2101_v45 = vpop.permute.xlu1 %2100 }
0x1357   :  { %v2103_v47 = vmul.f32 %v3555_v62, %v2101_v45 }
0x1359   :  { %2105 = vrot.lane.b32.xlu1 %v2103_v47, %s3783_s25 }
0x13c6   :  { %v2005_v51 = vpop.permute.xlu0 %2004 }
0x13c7   :  { %v4313_v52 = vadd.f32 %v2005_v51, %v1997_v48 }
0x13c9   :  { %3556 = vtanh.f32 %v4313_v52 }
0x13cb   :  { %v2106_v55 = vpop.permute.xlu1 %2105 }
0x13cc   :  { %v4317_v57 = vadd.f32 %v2106_v55, %v2098_v54 }
0x13ce   :  { %3558 = vtanh.f32 %v4317_v57 }
0x13d3   :  { %v3557_v6 = vpop.eup %3556 }
0x13d4   :  { %2010 = vrot.lane.b32.xlu0 %v3557_v6, %s3785_s30 }
0x13d8   :  { %v3559_v50 = vpop.eup %3558 }
0x13d9   :  { %2111 = vrot.lane.b32.xlu1 %v3559_v50, %s3785_s30 }
0x1446   :  { %v2011_v58 = vpop.permute.xlu0 %2010 }
0x1447   :  { %v2013_v59 = vmul.f32 %v3553_v15, %v2011_v58 }
0x1449   :  { %2015 = vrot.lane.b32.xlu0 %v2013_v59, %s3783_s25 }
0x144b   :  { %v2112_v63 = vpop.permute.xlu1 %2111 }
0x144c   :  { %v2114_v2 = vmul.f32 %v3555_v62, %v2112_v63  ;;  %v2587_v63 = vld [vmem:[%s4452_s7 + $0x8] sm:$0xff] }
0x144e   :  { %2188 = vrot.lane.b32.xlu1 %v2114_v2, %s3783_s25  ;;  %v2589_v2 = vld [vmem:[%s4452_s7 + $0x18] sm:$0xff] }
0x14bb   :  { %v2016_v3 = vpop.permute.xlu0 %2015 }
0x14bc   :  { %2018 = vst.msk [vmem:[#allocation2 - $0x2] sm:$0x80] %vm647_vm8, %v2016_v3  ;;  %3232 = vmatmul.mubr.msk.f32.vlgmr.msra.gmra.mrb[28].mxu0 %vm355_vm1, %v2016_v3  ;;  %v2586_v3 = vld [vmem:[%s4452_s7] sm:$0xff] }
0x14bd   :  { %3438 = vmatpush3.bf16.msra.mxu0 %v3952_v33  ;;  %3253 = vmatprep.mubr.msk.f32.mxu0 %vm3781_vm0, %v3782_v17 }
0x14be   :  { %3439 = vmatprep.subr.bf16.mxu0 %v3780_v1 }
0x14c0   :  { %v2189_v4 = vpop.permute.xlu1 %2188 }
0x14c1   :  { %3441 = vmatpush3.bf16.msra.mxu0 %v3959_v41  ;;  %3243 = vmatmul.mubr.msk.f32.vlgmr.msra.gmra.mrb[26].mxu1 %vm355_vm1, %v2189_v4 }
0x14c2   :  { %3448 = vmatprep.subr.bf16.mxu0 %v3780_v1  ;;  %3444 = vmatpush3.bf16.msra.mxu1 %v3995_v27 }
0x14c3   :  { %3445 = vmatprep.subr.bf16.mxu1 %v3780_v1  ;;  %3264 = vmatprep.mubr.msk.f32.mxu1 %vm3781_vm0, %v3782_v17 }
0x14c4   :  { %3254 = vmatmul.mubr.msk.f32.vlgmr.msra.gmra.mrb[30].mxu0 %vm355_vm1, %v2189_v4  ;;  %v3454_v4 = vpack.c.bf16 %v2589_v2, %v2587_v63 }
0x14c5   :  { %3450 = vmatpush3.bf16.msra.mxu0 %v4007_v34  ;;  %3275 = vmatprep.mubr.msk.f32.mxu0 %vm3781_vm0, %v3782_v17 }
0x14c6   :  { %3451 = vmatprep.subr.bf16.mxu0 %v3780_v1  ;;  %3447 = vmatpush3.bf16.msra.mxu1 %v3998_v29 }
0x14c7   :  { %3455 = vmatprep.subr.bf16.mxu1 %v3454_v4 }
0x14c9   :  { %3453 = vmatpush3.bf16.msra.mxu0 %v4015_v38 }
0x158f   :  { %v2183_v33 = vpop.f32.mrb[28].mxu0 }
0x1590   :  { %v3233_v41 = vpop.f32.mrb[29].mxu0 }
0x1591   :  { %v2591_v41 = vld [vmem:[%s4452_s7 + $0x28] sm:$0xff] }
0x1594   :  { %v2258_v27 = vpop.f32.mrb[26].mxu1 }
0x1595   :  { %v2259_v5 = vadd.f32 %v2258_v27, %v2183_v33  ;;  %v3244_v7 = vpop.f32.mrb[27].mxu1  ;;  %v2588_v33 = vld [vmem:[%s4452_s7 + $0x10] sm:$0xff]  ;;  %v2593_v27 = vld [vmem:[%s4452_s7 + $0x38] sm:$0xff] }
0x1596   :  { %v3458_v7 = vpack.c.bf16 %v2593_v27, %v2591_v41 }
0x1597   :  { %v2262_v9 = vadd.f32 %v4041_v49, %v2259_v5  ;;  %v2359_v34 = vpop.f32.mrb[30].mxu0  ;;  %v3456_v5 = vpack.c.bf16 %v2588_v33, %v2586_v3 }
0x1598   :  { %v2363_v10 = vadd.f32 %v2359_v34, %v333_v8  ;;  %v3255_v46 = vpop.f32.mrb[31].mxu0  ;;  %v2590_v8 = vld [vmem:[%s4452_s7 + $0x20] sm:$0xff] }
0x1599   :  { %v2828_v11 = vmul.f32 -1.442695, %v2262_v9  ;;  %v2592_v9 = vld [vmem:[%s4452_s7 + $0x30] sm:$0xff] }
0x159a   :  { %v2831_v12 = vmul.f32 -1.442695, %v2363_v10  ;;  %v3460_v34 = vpack.c.bf16 %v2592_v9, %v2590_v8 }
0x159b   :  { %3560 = vpow2.f32 %v2828_v11 }
0x159c   :  { %3562 = vpow2.f32 %v2831_v12 }
0x15a5   :  { %v3561_v1 = vpop.eup %3560 }
0x15a6   :  { %v3563_v29 = vpop.eup %3562  ;;  %v2266_v38 = vadd.f32 1.0, %v3561_v1 }
0x15a7   :  { %v2367_v13 = vadd.f32 1.0, %v3563_v29 }
0x15a8   :  { %3564 = vrcp.f32 %v2266_v38  ;;  %v2597_v38 = vshrl.u32 %v117_v60, 7 }
0x15a9   :  { %3566 = vrcp.f32 %v2367_v13 }
0x15aa   :  { %v2598_v13 = vsub.s32 0, %v2597_v38 }
0x15b2   :  { %v3565_v14 = vpop.eup %3564 }
0x15b3   :  { %v3567_v16 = vpop.eup %3566  ;;  %v2269_v18 = vmul.f32 2.0, %v3565_v14  ;;  %v2271_v26 = vmul.f32 %v3565_v14, %v4313_v52 }
0x15b4   :  { %v2370_v20 = vmul.f32 2.0, %v3567_v16  ;;  %v2372_v28 = vmul.f32 %v3567_v16, %v4317_v57 }
0x15b5   :  { %v2829_v56 = vadd.f32 -1.0, %v2269_v18 }
0x15b6   :  { %v2832_v22 = vadd.f32 -1.0, %v2370_v20 }
0x15b7   :  { %2273 = vrot.lane.b32.xlu0 %v2829_v56, %s3785_s30 }
0x15b8   :  { %2374 = vrot.lane.b32.xlu1 %v2832_v22, %s3785_s30 }
0x1629   :  { %v2274_v49 = vpop.permute.xlu0 %2273 }
0x162a   :  { %v2375_v21 = vpop.permute.xlu1 %2374  ;;  %v2276_v24 = vmul.f32 %v3565_v14, %v2274_v49 }
0x162b   :  { %v2377_v25 = vmul.f32 %v3567_v16, %v2375_v21 }
0x162c   :  { %2278 = vrot.lane.b32.xlu0 %v2276_v24, %s3783_s25 }
0x162d   :  { %2379 = vrot.lane.b32.xlu1 %v2377_v25, %s3783_s25 }
0x169e   :  { %v2279_v30 = vpop.permute.xlu0 %2278 }
0x169f   :  { %v2380_v31 = vpop.permute.xlu1 %2379  ;;  %v2281_v32 = vadd.f32 %v2279_v30, %v2271_v26 }
0x16a0   :  { %v4353_v23 = vadd.f32 %v2380_v31, %v2372_v28 }
0x16a1   :  { %3568 = vtanh.f32 %v2281_v32 }
0x16a2   :  { %3570 = vtanh.f32 %v4353_v23 }
0x16ab   :  { %v3569_v35 = vpop.eup %3568 }
0x16ac   :  { %v3571_v36 = vpop.eup %3570  ;;  %2284 = vrot.lane.b32.xlu0 %v3569_v35, %s3785_s30 }
0x16ad   :  { %2385 = vrot.lane.b32.xlu1 %v3571_v36, %s3785_s30 }
0x171e   :  { %v2285_v37 = vpop.permute.xlu0 %2284 }
0x171f   :  { %v2386_v39 = vpop.permute.xlu1 %2385  ;;  %v2287_v40 = vmul.f32 %v3565_v14, %v2285_v37  ;;  %v2594_v14 = vld [vmem:[%s4453_s8] sm:$0x3]  ;;  %s3787_s8 = smov [#allocation13]  }
0x1720   :  { %v2388_v42 = vmul.f32 %v3567_v16, %v2386_v39  ;;  %v2602_v16 = vsub.s32 1, %v2597_v38  ;;  %v2599_v18 = vrot.slane %v2594_v14, %v2598_v13  ;;  %s2712_s6 = sshll.u32 %s3787_s8, 4  ;;  %s2713_s6 = int_to_ptr.vmem [resolvable:$true] %s2712_s6 }
0x1721   :  { %2289 = vrot.lane.b32.xlu0 %v2287_v40, %s3783_s25  ;;  %s3696_s24 = scalar_lea.vmem %s2713_s6, 256  ;;  %p3701_p13 = scmp.lt.s32.totalorder %s2713_s6, %s2713_s6 }
0x1722   :  { %2462 = vrot.lane.b32.xlu1 %v2388_v42, %s3783_s25  ;;  %v2603_v20 = vrot.slane %v2594_v14, %v2602_v16  ;;  %p3697_p12 = scmp.ne.s32.totalorder %s2713_s6, %s3696_s24  ;;  %p3702_p0 = scmp.lt.s32.totalorder %s3696_s24, %s3696_s24 }
0x1724   :  { %p3703_p1 = por %p3702_p0, %p3701_p13 }
0x1726   :  { %p3704_p2 = pnand %p3703_p1, %p3697_p12 }
0x1793   :  { %v2290_v15 = vpop.permute.xlu0 %2289 }
0x1794   :  { %v2463_v61 = vpop.permute.xlu1 %2462  ;;  %2292 = vst.msk [vmem:[#allocation2 - $0x1] sm:$0x80] %vm647_vm8, %v2290_v15  ;;  %3265 = vmatmul.mubr.msk.f32.vlgmr.msra.gmra.mrb[28].mxu1 %vm355_vm1, %v2290_v15 }
0x1795   :  { %2568 = vst.msk [vmem:[#allocation13] sm:$0xff] %vm355_vm1, %v2463_v61  ;;  %3276 = vmatmul.mubr.msk.f32.vlgmr.msra.gmra.mrb[32].mxu0 %vm355_vm1, %v2463_v61  ;;  %2673 = vmatprep.mubr.f32.mxu1 %v3782_v17 }
0x1796   :  { %3457 = vmatpush1.bf16.msra.mxu1 %v3456_v5 }
0x1797   :  { %3459 = vmatprep.subr.bf16.mxu1 %v3458_v7 }
0x179a   :  { %3461 = vmatpush1.bf16.msra.mxu1 %v3460_v34 }
0x1867   :  { %v2457_v19 = vpop.f32.mrb[28].mxu1 }
0x1868   :  { %v2532_v62 = vpop.f32.mrb[32].mxu0  ;;  %v3266_v0 = vpop.f32.mrb[29].mxu1 }
0x1869   :  { %v2533_v53 = vadd.f32 %v2532_v62, %v2457_v19  ;;  %v3277_v43 = vpop.f32.mrb[33].mxu0 }
0x186b   :  { %v2536_v45 = vadd.f32 %v3585_v44, %v2533_v53 }
0x186d   :  { %v2835_v47 = vmul.f32 -1.442695, %v2536_v45 }
0x186f   :  { %3572 = vpow2.f32 %v2835_v47 }
0x1879   :  { %v3573_v48 = vpop.eup %3572 }
0x187a   :  { %v2540_v51 = vadd.f32 1.0, %v3573_v48 }
0x187c   :  { %3574 = vrcp.f32 %v2540_v51 }
0x1886   :  { %v3575_v52 = vpop.eup %3574 }
0x1887   :  { %v2543_v54 = vmul.f32 2.0, %v3575_v52  ;;  %v2545_v17 = vmul.f32 %v3575_v52, %v2281_v32 }
0x1889   :  { %v2836_v55 = vadd.f32 -1.0, %v2543_v54 }
0x188b   :  { %2547 = vrot.lane.b32.xlu0 %v2836_v55, %s3785_s30 }
0x18fd   :  { %v2548_v57 = vpop.permute.xlu0 %2547 }
0x18fe   :  { %v2550_v6 = vmul.f32 %v3575_v52, %v2548_v57 }
0x1900   :  { %2552 = vrot.lane.b32.xlu1 %v2550_v6, %s3783_s25 }
0x1972   :  { %v2553_v50 = vpop.permute.xlu1 %2552 }
0x1973   :  { %v2555_v58 = vadd.f32 %v2553_v50, %v2545_v17 }
0x1975   :  { %3576 = vtanh.f32 %v2555_v58 }
0x197f   :  { %v3577_v59 = vpop.eup %3576 }
0x1980   :  { %2558 = vrot.lane.b32.xlu0 %v3577_v59, %s3785_s30 }
0x19f2   :  { %v2559_v10 = vpop.permute.xlu0 %2558 }
0x19f3   :  { %v2561_v46 = vmul.f32 %v3575_v52, %v2559_v10 }
0x19f5   :  { %2563 = vrot.lane.b32.xlu1 %v2561_v46, %s3783_s25  ;;  %s3786_s25 = smov 96  }
0x1a67   :  { %v2564_v11 = vpop.permute.xlu1 %2563 }
0x1a68   :  { %2566 = vst.msk [vmem:[#allocation2] sm:$0x80] %vm647_vm8, %v2564_v11 }
0x1a69   :  { %2570 = vst.msk [vmem:[#allocation13 + $0x8] sm:$0xff] %vm355_vm1, %v2564_v11 }
0x1a6f   :  { %v2582_v12 = vld [vmem:[#allocation2] sm:$0xff] }
0x1a70   :  { %vm2583_vm0 = vcmp.gt.f32.partialorder %v2582_v12, 0.0  ;;  %v2584_v1 = vmul.f32 0.1, %v2582_v12 }
0x1a72   :  { %v2585_v29 = vsel %vm2583_vm0, %v2582_v12, %v2584_v1 }
0x1a73   :  { %2837 = vmatmul.mubr.msk.f32.vlgmr.msra.gmra.mrb[30].mxu1 %vm355_vm1, %v2585_v29 }
0x1b46   :  { %v2675_v56 = vpop.f32.mrb[30].mxu1 }
0x1b47   :  { %v2676_v22 = vadd.f32 %v2675_v56, %v2599_v18  ;;  %v2677_v49 = vpop.f32.mrb[31].mxu1 }
0x1b48   :  { %v2678_v21 = vadd.f32 %v2677_v49, %v2603_v20 }
0x1b4a   :  { %v2680_v24 = vmax.f32 %v2676_v22, %v2678_v21 }
0x1b4c   :  { %2681 = vmax.xlane.f32.xlu0 %v2680_v24 }
0x1b62   :  { %2572 = vrot.lane.b32.xlu0 %v4353_v23, %s3786_s25 }
0x1bd9   :  { %v2682_v25 = vpop.xlane.xlu0 %2681 }
0x1bda   :  { %v2683_v26 = vsub.f32 %v2676_v22, %v2682_v25  ;;  %v2684_v60 = vsub.f32 %v2678_v21, %v2682_v25 }
0x1bdc   :  { %v2685_v28 = vmul.f32 1.442695, %v2683_v26  ;;  %v2687_v30 = vmul.f32 1.442695, %v2684_v60 }
0x1bdd   :  { %v2573_v31 = vpop.permute.xlu0 %2572 }
0x1bde   :  { %3578 = vpow2.f32 %v2685_v28  ;;  %2575 = vst.msk [vmem:[#allocation15] sm:$0xff] %vm355_vm1, %v2573_v31 }
0x1bdf   :  { %3580 = vpow2.f32 %v2687_v30 }
0x1be8   :  { %v3579_v32 = vpop.eup %3578 }
0x1be9   :  { %v3581_v35 = vpop.eup %3580 }
0x1bea   :  { %v2689_v36 = vadd.f32 %v3581_v35, %v3579_v32 }
0x1bec   :  { %2690 = vadd.xlane.f32.xlu1 %v2689_v36 }
0x1bfd   :  { %2577 = vrot.lane.b32.xlu1 %v2555_v58, %s3786_s25 }
0x1bfe   :  { %3707 = shalt.err (!%p3704_p2)
}
0x1bff   :  { %s3708_s0 = scalar_lea.hbm %s4457_s12, 256 }
0x1c00   :  { %p3709_p3 = scmp.ne.s32.totalorder %s4457_s12, %s3708_s0  ;;  %p3712_p4 = scmp.lt.u32.totalorder %s3708_s0, %s4457_s12 }
0x1c02   :  { %p3714_p5 = pnand %p3712_p4, %p3709_p3 }
0x1c04   :  { %3717 = shalt.err (!%p3714_p5)
}
0x1c05   :  { %2718 = dma.vmem_to_hbm [thread:$0]  %s2713_s6, 256, %s4457_s12, [#allocation14], %s3774_s20, %s3774_s20, %s3775_s21  }
0x1c06   :  { %s3788_s15 = smov [#allocation15]  }
0x1c07   :  { %s2724_s9 = sshll.u32 %s3788_s15, 4  ;;  %s2725_s9 = int_to_ptr.vmem [resolvable:$true] %s2724_s9 }
0x1c08   :  { %s3718_s16 = scalar_lea.vmem %s2725_s9, 256  ;;  %p3723_p7 = scmp.lt.s32.totalorder %s2725_s9, %s2725_s9 }
0x1c09   :  { %p3719_p6 = scmp.ne.s32.totalorder %s2725_s9, %s3718_s16  ;;  %p3724_p8 = scmp.lt.s32.totalorder %s3718_s16, %s3718_s16 }
0x1c0b   :  { %p3725_p9 = por %p3724_p8, %p3723_p7 }
0x1c0d   :  { %p3726_p10 = pnand %p3725_p9, %p3719_p6 }
0x1c79   :  { %v2691_v23 = vpop.xlane.xlu1 %2690 }
0x1c7a   :  { %3582 = vrcp.f32 %v2691_v23 }
0x1c7d   :  { %v2578_v37 = vpop.permute.xlu1 %2577 }
0x1c7e   :  { %2581 = vst.msk [vmem:[#allocation15 + $0x8] sm:$0xff] %vm355_vm1, %v2578_v37 }
0x1c7f   :  { %3729 = shalt.err (!%p3726_p10)
}
0x1c80   :  { %s3730_s30 = scalar_lea.hbm %s4458_s13, 256 }
0x1c81   :  { %p3731_p11 = scmp.ne.s32.totalorder %s4458_s13, %s3730_s30  ;;  %p3734_p12 = scmp.lt.u32.totalorder %s3730_s30, %s4458_s13 }
0x1c83   :  { %p3736_p13 = pnand %p3734_p12, %p3731_p11 }
0x1c85   :  { %3739 = shalt.err (!%p3736_p13)
}
0x1c86   :  { %2730 = dma.vmem_to_hbm [thread:$0]  %s2725_s9, 256, %s4458_s13, [#allocation14], %s3774_s20, %s3774_s20, %s3775_s21   ;;  %v3583_v39 = vpop.eup %3582 }
0x1c87   :  { %s3789_s7 = smov [#allocation12]   ;;  %v2693_v40 = vmul.f32 %v3583_v39, %v3579_v32  ;;  %v2694_v42 = vmul.f32 %v3583_v39, %v3581_v35 }
0x1c88   :  { %s2703_s23 = sshll.u32 %s3789_s7, 4  ;;  %s2704_s23 = int_to_ptr.vmem [resolvable:$true] %s2703_s23 }
0x1c89   :  { %2695 = vst [vmem:[#allocation12] sm:$0xff] %v2693_v40  ;;  %2696 = vst [vmem:[#allocation12 + $0x8] sm:$0xff] %v2694_v42  ;;  %s3740_s25 = scalar_lea.vmem %s2704_s23, 256  ;;  %p3745_p1 = scmp.lt.s32.totalorder %s2704_s23, %s2704_s23 }
0x1c8a   :  { %p3741_p0 = scmp.ne.s32.totalorder %s2704_s23, %s3740_s25  ;;  %p3746_p2 = scmp.lt.s32.totalorder %s3740_s25, %s3740_s25 }
0x1c8c   :  { %p3747_p3 = por %p3746_p2, %p3745_p1 }
0x1c8e   :  { %p3748_p4 = pnand %p3747_p3, %p3741_p0 }
0x1c90   :  { %3751 = shalt.err (!%p3748_p4)
}
0x1c91   :  { %s3752_s24 = scalar_lea.hbm %s4456_s11, 256 }
0x1c92   :  { %p3753_p5 = scmp.ne.s32.totalorder %s4456_s11, %s3752_s24  ;;  %p3756_p6 = scmp.lt.u32.totalorder %s3752_s24, %s4456_s11 }
0x1c94   :  { %p3758_p7 = pnand %p3756_p6, %p3753_p5 }
0x1c96   :  { %3761 = shalt.err (!%p3758_p7)
}
0x1c97   :  { %2706 = dma.vmem_to_hbm [thread:$0]  %s2704_s23, 256, %s4456_s11, [#allocation5]  }
0x1c98   :  { %3768 = dma.done.wait [#allocation5], 256  }
0x1c99   :  { %3769 = vsyncadd [#allocation5], 4294967040 }
0x1c9a   :  { %3770 = dma.done.wait [#allocation14], 512  }
0x1c9b   :  { %3771 = vsyncadd [#allocation14], 4294966784 }
0x1c9c   :  { %2740 = vsyncpa [#allocation4], 1 }
0x1c9d   :  { %2741 = vsyncpa [#allocation7], 1 }
0x1c9e   :  { %2742 = vsyncpa [#allocation10], 1 }
0x1c9f   :  { %2743 = vsyncpa [#allocation5], 1 }
0x1ca0   :  { %2744 = vsyncpa [#allocation14], 1 }

</bundles_post_ra>
